<compile_context>
chip_gen: v7x
topology: tpu7x:2x2x1
jax: 0.10.0
libtpu: 0.0.40
codegen_flags: <defaults>
</compile_context>

<pallas_src>
import jax
import jax.numpy as jnp
from jax.experimental import pallas as pl
from jax.experimental.pallas import tpu as pltpu


LANE = 128     # TPU vreg lane width
SUBLANE = 8    # TPU vreg sublane width (f32)


def _round_up(x, m):
    return ((x + m - 1) // m) * m


def make_lstm_kernel(tt, h_pad, t_real, t_pad):
    """Kernel body for one (batch-block, time-chunk) grid cell."""
    needs_mask = (t_pad != t_real)

    def kernel(xproj_ref, whh_ref, hout_ref, h_sc, c_sc):
        tc = pl.program_id(1)          # time-chunk index (inner, sequential)
        n_tc = pl.num_programs(1)

        # PyTorch default h0 = c0 = 0; re-init for every batch block.
        @pl.when(tc == 0)
        def _():
            h_sc[...] = jnp.zeros_like(h_sc)
            c_sc[...] = jnp.zeros_like(c_sc)

        whh = whh_ref[...]             # (H_pad, 4*H_pad), VMEM-resident

        def step(lt, carry):
            h, c = carry
            # Input projection (+ fused bias) was precomputed; only the
            # recurrent matmul remains on the serial critical path.
            gates = xproj_ref[lt] + jnp.dot(
                h.astype(whh.dtype), whh, preferred_element_type=jnp.float32)
            # PyTorch gate order: input, forget, cell(g), output.
            # Slices are lane-aligned because h_pad % 128 == 0.
            i = jax.nn.sigmoid(gates[:, 0 * h_pad:1 * h_pad])
            f = jax.nn.sigmoid(gates[:, 1 * h_pad:2 * h_pad])
            g = jnp.tanh(gates[:, 2 * h_pad:3 * h_pad])
            o = jax.nn.sigmoid(gates[:, 3 * h_pad:4 * h_pad])
            c_new = f * c + i * g
            h_new = o * jnp.tanh(c_new)
            if needs_mask:  # only emitted when T was padded up to a chunk multiple
                valid = (tc * tt + lt) < t_real
                h_new = jnp.where(valid, h_new, h)
                c_new = jnp.where(valid, c_new, c)
            return h_new, c_new

        h_fin, c_fin = jax.lax.fori_loop(
            0, tt, step, (h_sc[...], c_sc[...]), unroll=True)
        h_sc[...] = h_fin
        c_sc[...] = c_fin

        # Lane-dense output: last-timestep hidden state.  The tiny FC to
        # num_classes is done outside the kernel.
        @pl.when(tc == n_tc - 1)
        def _():
            hout_ref[...] = h_fin.astype(hout_ref.dtype)

    return kernel


def lstm_emotion_classifier_forward(token_ids, params, *, time_chunk=16,
                                    matmul_dtype=jnp.float32):
    """token_ids: int32 [B, T]. Returns logits [B, num_classes] (float32)."""
    emb = params["embedding"]                  # (V, E), padding row zeroed
    w_ih = params["w_ih"]                      # (4H, E)
    w_hh = params["w_hh"]                      # (4H, H)
    b = params["b_ih"] + params["b_hh"]        # (4H,)
    w_fc = params["w_fc"]                      # (C, H)
    b_fc = params["b_fc"]                      # (C,)

    B, T = token_ids.shape
    H = w_hh.shape[1]

    # ---- TPU-friendly padded sizes ------------------------------------------
    h_pad = _round_up(max(H, LANE), LANE)      # lane-aligned per-gate slices
    bb = SUBLANE                               # batch rows per grid block
    b_pad = _round_up(max(B, bb), bb)
    nb = b_pad // bb
    tt = min(time_chunk, T)                    # timesteps per grid step
    t_pad = _round_up(T, tt)
    nt = t_pad // tt

    def pad_gate_rows(w):
        # (4H, X) -> (4*h_pad, X), padding each gate block independently.
        w4 = w.reshape(4, H, -1)
        w4 = jnp.pad(w4, ((0, 0), (0, h_pad - H), (0, 0)))
        return w4.reshape(4 * h_pad, -1)

    w_ih_p = pad_gate_rows(w_ih)                           # (4*h_pad, E)
    w_hh_p = pad_gate_rows(w_hh)                           # (4*h_pad, H)
    w_hh_p = jnp.pad(w_hh_p, ((0, 0), (0, h_pad - H)))     # (4*h_pad, h_pad)
    b_p = jnp.pad(b.reshape(4, H), ((0, 0), (0, h_pad - H))).reshape(-1)

    # ---- hoist the input projection out of the recurrence -------------------
    # (emb @ W_ih^T + b)[tok] == emb[tok] @ W_ih^T + b : project the table once
    # (single large MXU-friendly matmul), then gather per token.
    proj_table = jnp.dot(emb, w_ih_p.T,
                         preferred_element_type=jnp.float32) + b_p   # (V, 4*h_pad)
    x_proj = jnp.take(proj_table, token_ids, axis=0)       # (B, T, 4*h_pad)
    x_proj = jnp.transpose(x_proj, (1, 0, 2))              # (T, B, 4*h_pad)
    x_proj = jnp.pad(x_proj, ((0, t_pad - T), (0, b_pad - B), (0, 0)))
    # TODO(synk): for very long T / large B, gather inside the kernel via
    # scalar-prefetched token ids instead of materializing x_proj in HBM.

    w_hh_t = w_hh_p.T.astype(matmul_dtype)                 # (h_pad, 4*h_pad)

    kernel = make_lstm_kernel(tt, h_pad, T, t_pad)

    h_last = pl.pallas_call(
        kernel,
        out_shape=jax.ShapeDtypeStruct((b_pad, h_pad), jnp.float32),
        grid_spec=pltpu.PrefetchScalarGridSpec(
            num_scalar_prefetch=0,
            grid=(nb, nt),                                  # (batch blocks, time chunks)
            in_specs=[
                pl.BlockSpec((tt, bb, 4 * h_pad), lambda ib, it: (it, ib, 0)),
                pl.BlockSpec((h_pad, 4 * h_pad), lambda ib, it: (0, 0)),
            ],
            out_specs=pl.BlockSpec((bb, h_pad), lambda ib, it: (ib, 0)),
            scratch_shapes=[
                pltpu.VMEM((bb, h_pad), jnp.float32),       # h state
                pltpu.VMEM((bb, h_pad), jnp.float32),       # c state
            ],
        ),
        compiler_params=pltpu.CompilerParams(
            dimension_semantics=("parallel", "arbitrary")),
    )(x_proj, w_hh_t)

    h_t = h_last[:B, :H]                                    # strip padding
    logits = jnp.dot(h_t, w_fc.T, preferred_element_type=jnp.float32) + b_fc
    return logits


def reference_forward(token_ids, params):
    """Plain-JAX reference matching PyTorch semantics (for correctness check)."""
    emb = params["embedding"]
    w_ih, w_hh = params["w_ih"], params["w_hh"]
    b = params["b_ih"] + params["b_hh"]
    H = w_hh.shape[1]
    x = jnp.take(emb, token_ids, axis=0)                    # (B, T, E)
    B, T, _ = x.shape
    h = jnp.zeros((B, H), jnp.float32)
    c = jnp.zeros((B, H), jnp.float32)
    for t in range(T):
        gates = x[:, t] @ w_ih.T + h @ w_hh.T + b
        i = jax.nn.sigmoid(gates[:, 0 * H:1 * H])
        f = jax.nn.sigmoid(gates[:, 1 * H:2 * H])
        g = jnp.tanh(gates[:, 2 * H:3 * H])
        o = jax.nn.sigmoid(gates[:, 3 * H:4 * H])
        c = f * c + i * g
        h = o * jnp.tanh(c)
    return h @ params["w_fc"].T + params["b_fc"]


def init_params(key, vocab_size, embed_dim, hidden_dim, num_classes,
                padding_idx=0):
    ks = jax.random.split(key, 7)
    s = 0.1
    emb = s * jax.random.normal(ks[0], (vocab_size, embed_dim), jnp.float32)
    emb = emb.at[padding_idx].set(0.0)      # nn.Embedding padding_idx row = 0

    w_ih = s * jax.random.normal(ks[1], (4 * hidden_dim, embed_dim), jnp.float32)
    w_hh = s * jax.random.normal(ks[2], (4 * hidden_dim, hidden_dim), jnp.float32)
    b_ih = s * jax.random.normal(ks[3], (4 * hidden_dim,), jnp.float32)
    b_hh = s * jax.random.normal(ks[4], (4 * hidden_dim,), jnp.float32)
    w_fc = s * jax.random.normal(ks[5], (num_classes, hidden_dim), jnp.float32)
    b_fc = s * jax.random.normal(ks[6], (num_classes,), jnp.float32)

    return {"embedding": emb, "w_ih": w_ih, "w_hh": w_hh,
            "b_ih": b_ih, "b_hh": b_hh, "w_fc": w_fc, "b_fc": b_fc}


if __name__ == "__main__":
    vocab_size, embed_dim, hidden_dim, num_classes = 16, 32, 32, 4
    batch, seq_len = 2, 8

    key = jax.random.PRNGKey(0)
    k_tok, k_par = jax.random.split(key)

    token_ids = jax.random.randint(k_tok, (batch, seq_len), 0, vocab_size,
                                   dtype=jnp.int32)
    params = init_params(k_par, vocab_size, embed_dim, hidden_dim, num_classes)

    logits = lstm_emotion_classifier_forward(token_ids, params)
    jax.block_until_ready(logits)
    assert logits.shape == (batch, num_classes)

    ref = reference_forward(token_ids, params)
    max_err = float(jnp.max(jnp.abs(logits - ref)))
    assert max_err < 1e-3, f"mismatch vs reference: {max_err}"

    print("KERNEL_OK")
</pallas_src>

<mosaic_0001>
module attributes {stable_mosaic.version = 11 : i64} {
  func.func @kernel(%arg0: i32, %arg1: i32, %arg2: memref<8x8x512xf32, #tpu.memory_space<vmem>>, %arg3: memref<128x512xf32, #tpu.memory_space<vmem>>, %arg4: memref<8x128xf32, #tpu.memory_space<vmem>>, %arg5: memref<8x128xf32, #tpu.memory_space<vmem>>, %arg6: memref<8x128xf32, #tpu.memory_space<vmem>>) attributes {dimension_semantics = [#tpu.dimension_semantics<parallel>, #tpu.dimension_semantics<arbitrary>], iteration_bounds = array<i64: 1, 1>, scalar_prefetch = 0 : i64, scratch_operands = 2 : i64, tpu.core_type = #tpu.core_type<tc>, window_params = [{transform_indices = @transform_0, window_bounds = array<i64: 8, 8, 512>}, {pipeline_mode = #tpu.pipeline_mode<synchronous>, transform_indices = @transform_1, window_bounds = array<i64: 128, 512>}, {transform_indices = @transform_2, window_bounds = array<i64: 8, 128>}]} {
    %c0_i32 = arith.constant 0 : i32
    %0 = arith.cmpi eq, %arg1, %c0_i32 : i32
    %1 = arith.extui %0 : i1 to i32
    %c0_i32_0 = arith.constant 0 : i32
    %2 = arith.cmpi ne, %1, %c0_i32_0 : i32
    scf.if %2 {
      %cst_60 = arith.constant 0.000000e+00 : f32
      %251 = vector.broadcast %cst_60 : f32 to vector<8x128xf32>
      %c0_61 = arith.constant 0 : index
      %c0_62 = arith.constant 0 : index
      %252 = vector.load %arg5[%c0_61, %c0_62] : memref<8x128xf32, #tpu.memory_space<vmem>>, vector<8x128xf32>
      tpu.vector_store %arg5[%c0_61, %c0_62], %251 {strides = array<i32>} : memref<8x128xf32, #tpu.memory_space<vmem>>, vector<8x128xf32>,
      %cst_63 = arith.constant 0.000000e+00 : f32
      %253 = vector.broadcast %cst_63 : f32 to vector<8x128xf32>
      %c0_64 = arith.constant 0 : index
      %c0_65 = arith.constant 0 : index
      %254 = vector.load %arg6[%c0_64, %c0_65] : memref<8x128xf32, #tpu.memory_space<vmem>>, vector<8x128xf32>
      tpu.vector_store %arg6[%c0_64, %c0_65], %253 {strides = array<i32>} : memref<8x128xf32, #tpu.memory_space<vmem>>, vector<8x128xf32>,
    } else {
    }
    %c0 = arith.constant 0 : index
    %c0_1 = arith.constant 0 : index
    %3 = vector.load %arg3[%c0, %c0_1] : memref<128x512xf32, #tpu.memory_space<vmem>>, vector<128x512xf32>
    %c0_2 = arith.constant 0 : index
    %c0_3 = arith.constant 0 : index
    %4 = vector.load %arg5[%c0_2, %c0_3] : memref<8x128xf32, #tpu.memory_space<vmem>>, vector<8x128xf32>
    %c0_4 = arith.constant 0 : index
    %c0_5 = arith.constant 0 : index
    %5 = vector.load %arg6[%c0_4, %c0_5] : memref<8x128xf32, #tpu.memory_space<vmem>>, vector<8x128xf32>
    %c0_i32_6 = arith.constant 0 : i32
    %6 = arith.index_cast %c0_i32_6 : i32 to index
    %c0_7 = arith.constant 0 : index
    %c0_8 = arith.constant 0 : index
    %7 = vector.load %arg2[%6, %c0_7, %c0_8] : memref<8x8x512xf32, #tpu.memory_space<vmem>>, vector<1x8x512xf32>
    %8 = vector.shape_cast %7 : vector<1x8x512xf32> to vector<8x512xf32>
    %cst = arith.constant dense<0.000000e+00> : vector<8x512xf32>
    %9 = tpu.matmul %4, %3, %cst {dimension_numbers = #tpu.dot_dimension_numbers<[1], [0], [0], [1], [0, 0, 1, 1], [], []>} : vector<8x128xf32>, vector<128x512xf32>, vector<8x512xf32> -> vector<8x512xf32>
    %10 = arith.addf %8, %9 : vector<8x512xf32>
    %11 = vector.extract_strided_slice %10 {offsets = [0, 0], sizes = [8, 128], strides = [1, 1]} : vector<8x512xf32> to vector<8x128xf32>
    %12 = arith.negf %11 : vector<8x128xf32>
    %13 = math.exp %12 : vector<8x128xf32>
    %cst_9 = arith.constant 1.000000e+00 : f32
    %14 = vector.broadcast %cst_9 : f32 to vector<8x128xf32>
    %15 = arith.addf %14, %13 : vector<8x128xf32>
    %16 = arith.divf %14, %15 : vector<8x128xf32>
    %17 = vector.extract_strided_slice %10 {offsets = [0, 128], sizes = [8, 128], strides = [1, 1]} : vector<8x512xf32> to vector<8x128xf32>
    %18 = arith.negf %17 : vector<8x128xf32>
    %19 = math.exp %18 : vector<8x128xf32>
    %cst_10 = arith.constant 1.000000e+00 : f32
    %20 = vector.broadcast %cst_10 : f32 to vector<8x128xf32>
    %21 = arith.addf %20, %19 : vector<8x128xf32>
    %22 = arith.divf %20, %21 : vector<8x128xf32>
    %23 = vector.extract_strided_slice %10 {offsets = [0, 256], sizes = [8, 128], strides = [1, 1]} : vector<8x512xf32> to vector<8x128xf32>
    %24 = math.tanh %23 : vector<8x128xf32>
    %25 = vector.extract_strided_slice %10 {offsets = [0, 384], sizes = [8, 128], strides = [1, 1]} : vector<8x512xf32> to vector<8x128xf32>
    %26 = arith.negf %25 : vector<8x128xf32>
    %27 = math.exp %26 : vector<8x128xf32>
    %cst_11 = arith.constant 1.000000e+00 : f32
    %28 = vector.broadcast %cst_11 : f32 to vector<8x128xf32>
    %29 = arith.addf %28, %27 : vector<8x128xf32>
    %30 = arith.divf %28, %29 : vector<8x128xf32>
    %31 = arith.mulf %22, %5 : vector<8x128xf32>
    %32 = arith.mulf %16, %24 : vector<8x128xf32>
    %33 = arith.addf %31, %32 : vector<8x128xf32>
    %34 = math.tanh %33 : vector<8x128xf32>
    %35 = arith.mulf %30, %34 : vector<8x128xf32>
    %c1_i32 = arith.constant 1 : i32
    %36 = arith.index_cast %c1_i32 : i32 to index
    %c0_12 = arith.constant 0 : index
    %c0_13 = arith.constant 0 : index
    %37 = vector.load %arg2[%36, %c0_12, %c0_13] : memref<8x8x512xf32, #tpu.memory_space<vmem>>, vector<1x8x512xf32>
    %38 = vector.shape_cast %37 : vector<1x8x512xf32> to vector<8x512xf32>
    %cst_14 = arith.constant dense<0.000000e+00> : vector<8x512xf32>
    %39 = tpu.matmul %35, %3, %cst_14 {dimension_numbers = #tpu.dot_dimension_numbers<[1], [0], [0], [1], [0, 0, 1, 1], [], []>} : vector<8x128xf32>, vector<128x512xf32>, vector<8x512xf32> -> vector<8x512xf32>
    %40 = arith.addf %38, %39 : vector<8x512xf32>
    %41 = vector.extract_strided_slice %40 {offsets = [0, 0], sizes = [8, 128], strides = [1, 1]} : vector<8x512xf32> to vector<8x128xf32>
    %42 = arith.negf %41 : vector<8x128xf32>
    %43 = math.exp %42 : vector<8x128xf32>
    %cst_15 = arith.constant 1.000000e+00 : f32
    %44 = vector.broadcast %cst_15 : f32 to vector<8x128xf32>
    %45 = arith.addf %44, %43 : vector<8x128xf32>
    %46 = arith.divf %44, %45 : vector<8x128xf32>
    %47 = vector.extract_strided_slice %40 {offsets = [0, 128], sizes = [8, 128], strides = [1, 1]} : vector<8x512xf32> to vector<8x128xf32>
    %48 = arith.negf %47 : vector<8x128xf32>
    %49 = math.exp %48 : vector<8x128xf32>
    %cst_16 = arith.constant 1.000000e+00 : f32
    %50 = vector.broadcast %cst_16 : f32 to vector<8x128xf32>
    %51 = arith.addf %50, %49 : vector<8x128xf32>
    %52 = arith.divf %50, %51 : vector<8x128xf32>
    %53 = vector.extract_strided_slice %40 {offsets = [0, 256], sizes = [8, 128], strides = [1, 1]} : vector<8x512xf32> to vector<8x128xf32>
    %54 = math.tanh %53 : vector<8x128xf32>
    %55 = vector.extract_strided_slice %40 {offsets = [0, 384], sizes = [8, 128], strides = [1, 1]} : vector<8x512xf32> to vector<8x128xf32>
    %56 = arith.negf %55 : vector<8x128xf32>
    %57 = math.exp %56 : vector<8x128xf32>
    %cst_17 = arith.constant 1.000000e+00 : f32
    %58 = vector.broadcast %cst_17 : f32 to vector<8x128xf32>
    %59 = arith.addf %58, %57 : vector<8x128xf32>
    %60 = arith.divf %58, %59 : vector<8x128xf32>
    %61 = arith.mulf %52, %33 : vector<8x128xf32>
    %62 = arith.mulf %46, %54 : vector<8x128xf32>
    %63 = arith.addf %61, %62 : vector<8x128xf32>
    %64 = math.tanh %63 : vector<8x128xf32>
    %65 = arith.mulf %60, %64 : vector<8x128xf32>
    %c2_i32 = arith.constant 2 : i32
    %66 = arith.index_cast %c2_i32 : i32 to index
    %c0_18 = arith.constant 0 : index
    %c0_19 = arith.constant 0 : index
    %67 = vector.load %arg2[%66, %c0_18, %c0_19] : memref<8x8x512xf32, #tpu.memory_space<vmem>>, vector<1x8x512xf32>
    %68 = vector.shape_cast %67 : vector<1x8x512xf32> to vector<8x512xf32>
    %cst_20 = arith.constant dense<0.000000e+00> : vector<8x512xf32>
    %69 = tpu.matmul %65, %3, %cst_20 {dimension_numbers = #tpu.dot_dimension_numbers<[1], [0], [0], [1], [0, 0, 1, 1], [], []>} : vector<8x128xf32>, vector<128x512xf32>, vector<8x512xf32> -> vector<8x512xf32>
    %70 = arith.addf %68, %69 : vector<8x512xf32>
    %71 = vector.extract_strided_slice %70 {offsets = [0, 0], sizes = [8, 128], strides = [1, 1]} : vector<8x512xf32> to vector<8x128xf32>
    %72 = arith.negf %71 : vector<8x128xf32>
    %73 = math.exp %72 : vector<8x128xf32>
    %cst_21 = arith.constant 1.000000e+00 : f32
    %74 = vector.broadcast %cst_21 : f32 to vector<8x128xf32>
    %75 = arith.addf %74, %73 : vector<8x128xf32>
    %76 = arith.divf %74, %75 : vector<8x128xf32>
    %77 = vector.extract_strided_slice %70 {offsets = [0, 128], sizes = [8, 128], strides = [1, 1]} : vector<8x512xf32> to vector<8x128xf32>
    %78 = arith.negf %77 : vector<8x128xf32>
    %79 = math.exp %78 : vector<8x128xf32>
    %cst_22 = arith.constant 1.000000e+00 : f32
    %80 = vector.broadcast %cst_22 : f32 to vector<8x128xf32>
    %81 = arith.addf %80, %79 : vector<8x128xf32>
    %82 = arith.divf %80, %81 : vector<8x128xf32>
    %83 = vector.extract_strided_slice %70 {offsets = [0, 256], sizes = [8, 128], strides = [1, 1]} : vector<8x512xf32> to vector<8x128xf32>
    %84 = math.tanh %83 : vector<8x128xf32>
    %85 = vector.extract_strided_slice %70 {offsets = [0, 384], sizes = [8, 128], strides = [1, 1]} : vector<8x512xf32> to vector<8x128xf32>
    %86 = arith.negf %85 : vector<8x128xf32>
    %87 = math.exp %86 : vector<8x128xf32>
    %cst_23 = arith.constant 1.000000e+00 : f32
    %88 = vector.broadcast %cst_23 : f32 to vector<8x128xf32>
    %89 = arith.addf %88, %87 : vector<8x128xf32>
    %90 = arith.divf %88, %89 : vector<8x128xf32>
    %91 = arith.mulf %82, %63 : vector<8x128xf32>
    %92 = arith.mulf %76, %84 : vector<8x128xf32>
    %93 = arith.addf %91, %92 : vector<8x128xf32>
    %94 = math.tanh %93 : vector<8x128xf32>
    %95 = arith.mulf %90, %94 : vector<8x128xf32>
    %c3_i32 = arith.constant 3 : i32
    %96 = arith.index_cast %c3_i32 : i32 to index
    %c0_24 = arith.constant 0 : index
    %c0_25 = arith.constant 0 : index
    %97 = vector.load %arg2[%96, %c0_24, %c0_25] : memref<8x8x512xf32, #tpu.memory_space<vmem>>, vector<1x8x512xf32>
    %98 = vector.shape_cast %97 : vector<1x8x512xf32> to vector<8x512xf32>
    %cst_26 = arith.constant dense<0.000000e+00> : vector<8x512xf32>
    %99 = tpu.matmul %95, %3, %cst_26 {dimension_numbers = #tpu.dot_dimension_numbers<[1], [0], [0], [1], [0, 0, 1, 1], [], []>} : vector<8x128xf32>, vector<128x512xf32>, vector<8x512xf32> -> vector<8x512xf32>
    %100 = arith.addf %98, %99 : vector<8x512xf32>
    %101 = vector.extract_strided_slice %100 {offsets = [0, 0], sizes = [8, 128], strides = [1, 1]} : vector<8x512xf32> to vector<8x128xf32>
    %102 = arith.negf %101 : vector<8x128xf32>
    %103 = math.exp %102 : vector<8x128xf32>
    %cst_27 = arith.constant 1.000000e+00 : f32
    %104 = vector.broadcast %cst_27 : f32 to vector<8x128xf32>
    %105 = arith.addf %104, %103 : vector<8x128xf32>
    %106 = arith.divf %104, %105 : vector<8x128xf32>
    %107 = vector.extract_strided_slice %100 {offsets = [0, 128], sizes = [8, 128], strides = [1, 1]} : vector<8x512xf32> to vector<8x128xf32>
    %108 = arith.negf %107 : vector<8x128xf32>
    %109 = math.exp %108 : vector<8x128xf32>
    %cst_28 = arith.constant 1.000000e+00 : f32
    %110 = vector.broadcast %cst_28 : f32 to vector<8x128xf32>
    %111 = arith.addf %110, %109 : vector<8x128xf32>
    %112 = arith.divf %110, %111 : vector<8x128xf32>
    %113 = vector.extract_strided_slice %100 {offsets = [0, 256], sizes = [8, 128], strides = [1, 1]} : vector<8x512xf32> to vector<8x128xf32>
    %114 = math.tanh %113 : vector<8x128xf32>
    %115 = vector.extract_strided_slice %100 {offsets = [0, 384], sizes = [8, 128], strides = [1, 1]} : vector<8x512xf32> to vector<8x128xf32>
    %116 = arith.negf %115 : vector<8x128xf32>
    %117 = math.exp %116 : vector<8x128xf32>
    %cst_29 = arith.constant 1.000000e+00 : f32
    %118 = vector.broadcast %cst_29 : f32 to vector<8x128xf32>
    %119 = arith.addf %118, %117 : vector<8x128xf32>
    %120 = arith.divf %118, %119 : vector<8x128xf32>
    %121 = arith.mulf %112, %93 : vector<8x128xf32>
    %122 = arith.mulf %106, %114 : vector<8x128xf32>
    %123 = arith.addf %121, %122 : vector<8x128xf32>
    %124 = math.tanh %123 : vector<8x128xf32>
    %125 = arith.mulf %120, %124 : vector<8x128xf32>
    %c4_i32 = arith.constant 4 : i32
    %126 = arith.index_cast %c4_i32 : i32 to index
    %c0_30 = arith.constant 0 : index
    %c0_31 = arith.constant 0 : index
    %127 = vector.load %arg2[%126, %c0_30, %c0_31] : memref<8x8x512xf32, #tpu.memory_space<vmem>>, vector<1x8x512xf32>
    %128 = vector.shape_cast %127 : vector<1x8x512xf32> to vector<8x512xf32>
    %cst_32 = arith.constant dense<0.000000e+00> : vector<8x512xf32>
    %129 = tpu.matmul %125, %3, %cst_32 {dimension_numbers = #tpu.dot_dimension_numbers<[1], [0], [0], [1], [0, 0, 1, 1], [], []>} : vector<8x128xf32>, vector<128x512xf32>, vector<8x512xf32> -> vector<8x512xf32>
    %130 = arith.addf %128, %129 : vector<8x512xf32>
    %131 = vector.extract_strided_slice %130 {offsets = [0, 0], sizes = [8, 128], strides = [1, 1]} : vector<8x512xf32> to vector<8x128xf32>
    %132 = arith.negf %131 : vector<8x128xf32>
    %133 = math.exp %132 : vector<8x128xf32>
    %cst_33 = arith.constant 1.000000e+00 : f32
    %134 = vector.broadcast %cst_33 : f32 to vector<8x128xf32>
    %135 = arith.addf %134, %133 : vector<8x128xf32>
    %136 = arith.divf %134, %135 : vector<8x128xf32>
    %137 = vector.extract_strided_slice %130 {offsets = [0, 128], sizes = [8, 128], strides = [1, 1]} : vector<8x512xf32> to vector<8x128xf32>
    %138 = arith.negf %137 : vector<8x128xf32>
    %139 = math.exp %138 : vector<8x128xf32>
    %cst_34 = arith.constant 1.000000e+00 : f32
    %140 = vector.broadcast %cst_34 : f32 to vector<8x128xf32>
    %141 = arith.addf %140, %139 : vector<8x128xf32>
    %142 = arith.divf %140, %141 : vector<8x128xf32>
    %143 = vector.extract_strided_slice %130 {offsets = [0, 256], sizes = [8, 128], strides = [1, 1]} : vector<8x512xf32> to vector<8x128xf32>
    %144 = math.tanh %143 : vector<8x128xf32>
    %145 = vector.extract_strided_slice %130 {offsets = [0, 384], sizes = [8, 128], strides = [1, 1]} : vector<8x512xf32> to vector<8x128xf32>
    %146 = arith.negf %145 : vector<8x128xf32>
    %147 = math.exp %146 : vector<8x128xf32>
    %cst_35 = arith.constant 1.000000e+00 : f32
    %148 = vector.broadcast %cst_35 : f32 to vector<8x128xf32>
    %149 = arith.addf %148, %147 : vector<8x128xf32>
    %150 = arith.divf %148, %149 : vector<8x128xf32>
    %151 = arith.mulf %142, %123 : vector<8x128xf32>
    %152 = arith.mulf %136, %144 : vector<8x128xf32>
    %153 = arith.addf %151, %152 : vector<8x128xf32>
    %154 = math.tanh %153 : vector<8x128xf32>
    %155 = arith.mulf %150, %154 : vector<8x128xf32>
    %c5_i32 = arith.constant 5 : i32
    %156 = arith.index_cast %c5_i32 : i32 to index
    %c0_36 = arith.constant 0 : index
    %c0_37 = arith.constant 0 : index
    %157 = vector.load %arg2[%156, %c0_36, %c0_37] : memref<8x8x512xf32, #tpu.memory_space<vmem>>, vector<1x8x512xf32>
    %158 = vector.shape_cast %157 : vector<1x8x512xf32> to vector<8x512xf32>
    %cst_38 = arith.constant dense<0.000000e+00> : vector<8x512xf32>
    %159 = tpu.matmul %155, %3, %cst_38 {dimension_numbers = #tpu.dot_dimension_numbers<[1], [0], [0], [1], [0, 0, 1, 1], [], []>} : vector<8x128xf32>, vector<128x512xf32>, vector<8x512xf32> -> vector<8x512xf32>
    %160 = arith.addf %158, %159 : vector<8x512xf32>
    %161 = vector.extract_strided_slice %160 {offsets = [0, 0], sizes = [8, 128], strides = [1, 1]} : vector<8x512xf32> to vector<8x128xf32>
    %162 = arith.negf %161 : vector<8x128xf32>
    %163 = math.exp %162 : vector<8x128xf32>
    %cst_39 = arith.constant 1.000000e+00 : f32
    %164 = vector.broadcast %cst_39 : f32 to vector<8x128xf32>
    %165 = arith.addf %164, %163 : vector<8x128xf32>
    %166 = arith.divf %164, %165 : vector<8x128xf32>
    %167 = vector.extract_strided_slice %160 {offsets = [0, 128], sizes = [8, 128], strides = [1, 1]} : vector<8x512xf32> to vector<8x128xf32>
    %168 = arith.negf %167 : vector<8x128xf32>
    %169 = math.exp %168 : vector<8x128xf32>
    %cst_40 = arith.constant 1.000000e+00 : f32
    %170 = vector.broadcast %cst_40 : f32 to vector<8x128xf32>
    %171 = arith.addf %170, %169 : vector<8x128xf32>
    %172 = arith.divf %170, %171 : vector<8x128xf32>
    %173 = vector.extract_strided_slice %160 {offsets = [0, 256], sizes = [8, 128], strides = [1, 1]} : vector<8x512xf32> to vector<8x128xf32>
    %174 = math.tanh %173 : vector<8x128xf32>
    %175 = vector.extract_strided_slice %160 {offsets = [0, 384], sizes = [8, 128], strides = [1, 1]} : vector<8x512xf32> to vector<8x128xf32>
    %176 = arith.negf %175 : vector<8x128xf32>
    %177 = math.exp %176 : vector<8x128xf32>
    %cst_41 = arith.constant 1.000000e+00 : f32
    %178 = vector.broadcast %cst_41 : f32 to vector<8x128xf32>
    %179 = arith.addf %178, %177 : vector<8x128xf32>
    %180 = arith.divf %178, %179 : vector<8x128xf32>
    %181 = arith.mulf %172, %153 : vector<8x128xf32>
    %182 = arith.mulf %166, %174 : vector<8x128xf32>
    %183 = arith.addf %181, %182 : vector<8x128xf32>
    %184 = math.tanh %183 : vector<8x128xf32>
    %185 = arith.mulf %180, %184 : vector<8x128xf32>
    %c6_i32 = arith.constant 6 : i32
    %186 = arith.index_cast %c6_i32 : i32 to index
    %c0_42 = arith.constant 0 : index
    %c0_43 = arith.constant 0 : index
    %187 = vector.load %arg2[%186, %c0_42, %c0_43] : memref<8x8x512xf32, #tpu.memory_space<vmem>>, vector<1x8x512xf32>
    %188 = vector.shape_cast %187 : vector<1x8x512xf32> to vector<8x512xf32>
    %cst_44 = arith.constant dense<0.000000e+00> : vector<8x512xf32>
    %189 = tpu.matmul %185, %3, %cst_44 {dimension_numbers = #tpu.dot_dimension_numbers<[1], [0], [0], [1], [0, 0, 1, 1], [], []>} : vector<8x128xf32>, vector<128x512xf32>, vector<8x512xf32> -> vector<8x512xf32>
    %190 = arith.addf %188, %189 : vector<8x512xf32>
    %191 = vector.extract_strided_slice %190 {offsets = [0, 0], sizes = [8, 128], strides = [1, 1]} : vector<8x512xf32> to vector<8x128xf32>
    %192 = arith.negf %191 : vector<8x128xf32>
    %193 = math.exp %192 : vector<8x128xf32>
    %cst_45 = arith.constant 1.000000e+00 : f32
    %194 = vector.broadcast %cst_45 : f32 to vector<8x128xf32>
    %195 = arith.addf %194, %193 : vector<8x128xf32>
    %196 = arith.divf %194, %195 : vector<8x128xf32>
    %197 = vector.extract_strided_slice %190 {offsets = [0, 128], sizes = [8, 128], strides = [1, 1]} : vector<8x512xf32> to vector<8x128xf32>
    %198 = arith.negf %197 : vector<8x128xf32>
    %199 = math.exp %198 : vector<8x128xf32>
    %cst_46 = arith.constant 1.000000e+00 : f32
    %200 = vector.broadcast %cst_46 : f32 to vector<8x128xf32>
    %201 = arith.addf %200, %199 : vector<8x128xf32>
    %202 = arith.divf %200, %201 : vector<8x128xf32>
    %203 = vector.extract_strided_slice %190 {offsets = [0, 256], sizes = [8, 128], strides = [1, 1]} : vector<8x512xf32> to vector<8x128xf32>
    %204 = math.tanh %203 : vector<8x128xf32>
    %205 = vector.extract_strided_slice %190 {offsets = [0, 384], sizes = [8, 128], strides = [1, 1]} : vector<8x512xf32> to vector<8x128xf32>
    %206 = arith.negf %205 : vector<8x128xf32>
    %207 = math.exp %206 : vector<8x128xf32>
    %cst_47 = arith.constant 1.000000e+00 : f32
    %208 = vector.broadcast %cst_47 : f32 to vector<8x128xf32>
    %209 = arith.addf %208, %207 : vector<8x128xf32>
    %210 = arith.divf %208, %209 : vector<8x128xf32>
    %211 = arith.mulf %202, %183 : vector<8x128xf32>
    %212 = arith.mulf %196, %204 : vector<8x128xf32>
    %213 = arith.addf %211, %212 : vector<8x128xf32>
    %214 = math.tanh %213 : vector<8x128xf32>
    %215 = arith.mulf %210, %214 : vector<8x128xf32>
    %c7_i32 = arith.constant 7 : i32
    %216 = arith.index_cast %c7_i32 : i32 to index
    %c0_48 = arith.constant 0 : index
    %c0_49 = arith.constant 0 : index
    %217 = vector.load %arg2[%216, %c0_48, %c0_49] : memref<8x8x512xf32, #tpu.memory_space<vmem>>, vector<1x8x512xf32>
    %218 = vector.shape_cast %217 : vector<1x8x512xf32> to vector<8x512xf32>
    %cst_50 = arith.constant dense<0.000000e+00> : vector<8x512xf32>
    %219 = tpu.matmul %215, %3, %cst_50 {dimension_numbers = #tpu.dot_dimension_numbers<[1], [0], [0], [1], [0, 0, 1, 1], [], []>} : vector<8x128xf32>, vector<128x512xf32>, vector<8x512xf32> -> vector<8x512xf32>
    %220 = arith.addf %218, %219 : vector<8x512xf32>
    %221 = vector.extract_strided_slice %220 {offsets = [0, 0], sizes = [8, 128], strides = [1, 1]} : vector<8x512xf32> to vector<8x128xf32>
    %222 = arith.negf %221 : vector<8x128xf32>
    %223 = math.exp %222 : vector<8x128xf32>
    %cst_51 = arith.constant 1.000000e+00 : f32
    %224 = vector.broadcast %cst_51 : f32 to vector<8x128xf32>
    %225 = arith.addf %224, %223 : vector<8x128xf32>
    %226 = arith.divf %224, %225 : vector<8x128xf32>
    %227 = vector.extract_strided_slice %220 {offsets = [0, 128], sizes = [8, 128], strides = [1, 1]} : vector<8x512xf32> to vector<8x128xf32>
    %228 = arith.negf %227 : vector<8x128xf32>
    %229 = math.exp %228 : vector<8x128xf32>
    %cst_52 = arith.constant 1.000000e+00 : f32
    %230 = vector.broadcast %cst_52 : f32 to vector<8x128xf32>
    %231 = arith.addf %230, %229 : vector<8x128xf32>
    %232 = arith.divf %230, %231 : vector<8x128xf32>
    %233 = vector.extract_strided_slice %220 {offsets = [0, 256], sizes = [8, 128], strides = [1, 1]} : vector<8x512xf32> to vector<8x128xf32>
    %234 = math.tanh %233 : vector<8x128xf32>
    %235 = vector.extract_strided_slice %220 {offsets = [0, 384], sizes = [8, 128], strides = [1, 1]} : vector<8x512xf32> to vector<8x128xf32>
    %236 = arith.negf %235 : vector<8x128xf32>
    %237 = math.exp %236 : vector<8x128xf32>
    %cst_53 = arith.constant 1.000000e+00 : f32
    %238 = vector.broadcast %cst_53 : f32 to vector<8x128xf32>
    %239 = arith.addf %238, %237 : vector<8x128xf32>
    %240 = arith.divf %238, %239 : vector<8x128xf32>
    %241 = arith.mulf %232, %213 : vector<8x128xf32>
    %242 = arith.mulf %226, %234 : vector<8x128xf32>
    %243 = arith.addf %241, %242 : vector<8x128xf32>
    %244 = math.tanh %243 : vector<8x128xf32>
    %245 = arith.mulf %240, %244 : vector<8x128xf32>
    %c8_i32 = arith.constant 8 : i32
    %c0_54 = arith.constant 0 : index
    %c0_55 = arith.constant 0 : index
    %246 = vector.load %arg5[%c0_54, %c0_55] : memref<8x128xf32, #tpu.memory_space<vmem>>, vector<8x128xf32>
    tpu.vector_store %arg5[%c0_54, %c0_55], %245 {strides = array<i32>} : memref<8x128xf32, #tpu.memory_space<vmem>>, vector<8x128xf32>,
    %c0_56 = arith.constant 0 : index
    %c0_57 = arith.constant 0 : index
    %247 = vector.load %arg6[%c0_56, %c0_57] : memref<8x128xf32, #tpu.memory_space<vmem>>, vector<8x128xf32>
    tpu.vector_store %arg6[%c0_56, %c0_57], %243 {strides = array<i32>} : memref<8x128xf32, #tpu.memory_space<vmem>>, vector<8x128xf32>,
    %c0_i32_58 = arith.constant 0 : i32
    %248 = arith.cmpi eq, %arg1, %c0_i32_58 : i32
    %249 = arith.extui %248 : i1 to i32
    %c0_i32_59 = arith.constant 0 : i32
    %250 = arith.cmpi ne, %249, %c0_i32_59 : i32
    scf.if %250 {
      %c0_60 = arith.constant 0 : index
      %c0_61 = arith.constant 0 : index
      %251 = vector.load %arg4[%c0_60, %c0_61] : memref<8x128xf32, #tpu.memory_space<vmem>>, vector<8x128xf32>
      tpu.vector_store %arg4[%c0_60, %c0_61], %245 {strides = array<i32>} : memref<8x128xf32, #tpu.memory_space<vmem>>, vector<8x128xf32>,
    } else {
    }
    return
  }
  func.func @transform_0(%arg0: i32, %arg1: i32) -> (i32, i32, i32) {
    %c0_i32 = arith.constant 0 : i32
    %c0_i32_0 = arith.constant 0 : i32
    return %arg1, %arg0, %c0_i32 : i32, i32, i32
  }
  func.func @transform_1(%arg0: i32, %arg1: i32) -> (i32, i32) {
    %c0_i32 = arith.constant 0 : i32
    %c0_i32_0 = arith.constant 0 : i32
    %c0_i32_1 = arith.constant 0 : i32
    return %c0_i32, %c0_i32_0 : i32, i32
  }
  func.func @transform_2(%arg0: i32, %arg1: i32) -> (i32, i32) {
    %c0_i32 = arith.constant 0 : i32
    %c0_i32_0 = arith.constant 0 : i32
    return %arg0, %c0_i32 : i32, i32
  }
}

</mosaic_0001>

<bundles_post_ra>
// kernel: tpu_custom_call.1
= control target key start
LH: loop header
LB: loop body
LE: loop exit
PB: predicated region body
PF: predicated region fallthrough
CT: control target
= control target key end

     0   :  { %7 = vsyncpa [#allocation5], 0  ;;  %s2694_s0 = inlined_call_operand.hbm [shape: f32[8,8,512], index: 0, kind: input, shape index: {}]   ;;  %s2695_s1 = inlined_call_operand.hbm [shape: f32[128,512], index: 1, kind: input, shape index: {}]   ;;  %s2696_s2 = inlined_call_operand.hbm [shape: f32[8,128], index: 2, kind: output, shape index: {}]  }
   0x1   :  { %8 = vsyncpa [#allocation8], 0 }
   0x2   :  { %9 = vsyncpa [#allocation6], 0  ;;  %s2275_s9 = smov [#allocation4]   ;;  %s2203_s13 = scalar_lea.hbm %s2694_s0, 4096 }
   0x3   :  { %s15_s10 = sshll.u32 %s2275_s9, 4  ;;  %p2204_p0 = scmp.ne.s32.totalorder %s2694_s0, %s2203_s13  ;;  %s16_s10 = int_to_ptr.vmem [resolvable:$true] %s15_s10 }
   0x4   :  { %p2207_p1 = scmp.lt.u32.totalorder %s2203_s13, %s2694_s0 }
   0x6   :  { %p2209_p2 = pnand %p2207_p1, %p2204_p0 }
   0x8   :  { %2212 = shalt.err (!%p2209_p2)
}
   0x9   :  { %s2213_s18 = scalar_lea.vmem %s16_s10, 4096  ;;  %p2218_p4 = scmp.lt.s32.totalorder %s16_s10, %s16_s10 }
   0xa   :  { %p2214_p3 = scmp.ne.s32.totalorder %s16_s10, %s2213_s18  ;;  %p2219_p5 = scmp.lt.s32.totalorder %s2213_s18, %s2213_s18 }
   0xc   :  { %p2220_p6 = por %p2219_p5, %p2218_p4 }
   0xe   :  { %p2221_p7 = pnand %p2220_p6, %p2214_p3 }
  0x10   :  { %2224 = shalt.err (!%p2221_p7)
}
  0x11   :  { %s2276_s19 = smov 512   ;;  %s2277_s20 = smov 32  }
  0x12   :  { %21 = dma.hbm_to_vmem [thread:$0]  %s2694_s0, 4096, %s16_s10, [#allocation5], %s2276_s19, %s2276_s19, %s2277_s20  }
  0x13   :  { %s2278_s23 = smov [#allocation7]   ;;  %s2225_s27 = scalar_lea.hbm %s2695_s1, 8192 }
  0x14   :  { %s27_s24 = sshll.u32 %s2278_s23, 4  ;;  %p2226_p8 = scmp.ne.s32.totalorder %s2695_s1, %s2225_s27  ;;  %s28_s24 = int_to_ptr.vmem [resolvable:$true] %s27_s24 }
  0x15   :  { %p2229_p9 = scmp.lt.u32.totalorder %s2225_s27, %s2695_s1 }
  0x17   :  { %p2231_p10 = pnand %p2229_p9, %p2226_p8 }
  0x19   :  { %2234 = shalt.err (!%p2231_p10)
}
  0x1a   :  { %s2235_s4 = scalar_lea.vmem %s28_s24, 8192  ;;  %p2240_p12 = scmp.lt.s32.totalorder %s28_s24, %s28_s24 }
  0x1b   :  { %p2236_p11 = scmp.ne.s32.totalorder %s28_s24, %s2235_s4  ;;  %p2241_p13 = scmp.lt.s32.totalorder %s2235_s4, %s2235_s4 }
  0x1d   :  { %p2242_p0 = por %p2241_p13, %p2240_p12 }
  0x1f   :  { %p2243_p1 = pnand %p2242_p0, %p2236_p11 }
  0x21   :  { %2246 = shalt.err (!%p2243_p1)
}
  0x22   :  { %33 = dma.hbm_to_vmem [thread:$0]  %s2695_s1, 8192, %s28_s24, [#allocation8], %s2276_s19, %s2276_s19, %s2277_s20  }
  0x23   :  { %2269 = dma.done.wait [#allocation5], 4096  }
  0x24   :  { %2270 = vsyncadd [#allocation5], 4294963200 }
  0x25   :  { %2271 = dma.done.wait [#allocation8], 8192  }
  0x26   :  { %2272 = vsyncadd [#allocation8], 4294959104  ;;  %v2279_v0 = vmov 0.0   ;;  %v47_v1 = vld [vmem:[#allocation7 + $0x8] sm:$0xff]  ;;  %v46_v3 = vld [vmem:[#allocation7] sm:$0xff]  ;;  %s2280_s1 = smov [#allocation9]  }
  0x27   :  { %180 = vmatprep.mubr.f32.mxu0 %v2279_v0  ;;  %251 = vmatprep.mubr.f32.mxu1 %v2279_v0  ;;  %v51_v2 = vld [vmem:[#allocation7 + $0x28] sm:$0xff]  ;;  %v50_v5 = vld [vmem:[#allocation7 + $0x20] sm:$0xff]  ;;  %v49_v19 = vld [vmem:[#allocation7 + $0x18] sm:$0xff]  ;;  %s1523_s6 = sshll.u32 %s2280_s1, 4  ;;  %s1524_s6 = int_to_ptr.vmem [resolvable:$true] %s1523_s6 }
  0x28   :  { %v2322_v4 = vpack.c.bf16 %v51_v2, %v47_v1  ;;  %v55_v6 = vld [vmem:[#allocation7 + $0x48] sm:$0xff]  ;;  %v2324_v8 = vpack.c.bf16 %v50_v5, %v46_v3  ;;  %v54_v10 = vld [vmem:[#allocation7 + $0x40] sm:$0xff]  ;;  %v53_v20 = vld [vmem:[#allocation7 + $0x38] sm:$0xff]  ;;  %s2247_s7 = scalar_lea.vmem %s1524_s6, 128  ;;  %p2252_p3 = scmp.lt.s32.totalorder %s1524_s6, %s1524_s6 }
  0x29   :  { %v59_v7 = vld [vmem:[#allocation7 + $0x68] sm:$0xff]  ;;  %v58_v11 = vld [vmem:[#allocation7 + $0x60] sm:$0xff]  ;;  %v2335_v22 = vpack.c.bf16 %v53_v20, %v49_v19  ;;  %v48_v23 = vld [vmem:[#allocation7 + $0x10] sm:$0xff]  ;;  %p2248_p2 = scmp.ne.s32.totalorder %s1524_s6, %s2247_s7  ;;  %p2253_p4 = scmp.lt.s32.totalorder %s2247_s7, %s2247_s7 }
  0x2a   :  { %v2326_v9 = vpack.c.bf16 %v59_v7, %v55_v6  ;;  %v63_v12 = vld [vmem:[#allocation7 + $0x88] sm:$0xff]  ;;  %1558 = vmatprep.subr.bf16.mxu0 %v2322_v4  ;;  %v2330_v14 = vpack.c.bf16 %v58_v11, %v54_v10  ;;  %v62_v15 = vld [vmem:[#allocation7 + $0x80] sm:$0xff]  ;;  %v52_v24 = vld [vmem:[#allocation7 + $0x30] sm:$0xff] }
  0x2b   :  { %v67_v13 = vld [vmem:[#allocation7 + $0xa8] sm:$0xff]  ;;  %1560 = vmatpush1.bf16.msra.mxu0 %v2324_v8  ;;  %v66_v16 = vld [vmem:[#allocation7 + $0xa0] sm:$0xff]  ;;  %v2337_v25 = vpack.c.bf16 %v52_v24, %v48_v23  ;;  %1590 = vmatprep.subr.bf16.mxu1 %v2335_v22  ;;  %v57_v27 = vld [vmem:[#allocation7 + $0x58] sm:$0xff]  ;;  %p2254_p5 = por %p2253_p4, %p2252_p3 }
  0x2c   :  { %1562 = vmatprep.subr.bf16.mxu0 %v2326_v9  ;;  %v2333_v17 = vpack.c.bf16 %v67_v13, %v63_v12  ;;  %v71_v18 = vld [vmem:[#allocation7 + $0xc8] sm:$0xff]  ;;  %v2340_v26 = vpack.c.bf16 %v66_v16, %v62_v15  ;;  %v61_v28 = vld [vmem:[#allocation7 + $0x78] sm:$0xff]  ;;  %v56_v29 = vld [vmem:[#allocation7 + $0x50] sm:$0xff] }
  0x2d   :  { %v75_v21 = vld [vmem:[#allocation7 + $0xe8] sm:$0xff]  ;;  %v70_v31 = vld [vmem:[#allocation7 + $0xc0] sm:$0xff]  ;;  %1592 = vmatpush1.bf16.msra.mxu1 %v2337_v25  ;;  %v2347_v33 = vpack.c.bf16 %v61_v28, %v57_v27  ;;  %v60_v34 = vld [vmem:[#allocation7 + $0x70] sm:$0xff]  ;;  %p2255_p6 = pnand %p2254_p5, %p2248_p2 }
  0x2e   :  { %v2344_v30 = vpack.c.bf16 %v75_v21, %v71_v18  ;;  %v74_v32 = vld [vmem:[#allocation7 + $0xe0] sm:$0xff]  ;;  %v79_v35 = vld [vmem:[#allocation7 + $0x108] sm:$0xff]  ;;  %v2349_v37 = vpack.c.bf16 %v60_v34, %v56_v29  ;;  %v65_v38 = vld [vmem:[#allocation7 + $0x98] sm:$0xff] }
  0x2f   :  { %1564 = vmatpush1.bf16.msra.mxu0 %v2330_v14  ;;  %v83_v36 = vld [vmem:[#allocation7 + $0x128] sm:$0xff]  ;;  %1594 = vmatprep.subr.bf16.mxu1 %v2347_v33  ;;  %v69_v39 = vld [vmem:[#allocation7 + $0xb8] sm:$0xff]  ;;  %v64_v40 = vld [vmem:[#allocation7 + $0x90] sm:$0xff]  ;;  %v2353_v42 = vpack.c.bf16 %v74_v32, %v70_v31 }
  0x30   :  { %1566 = vmatprep.subr.bf16.mxu0 %v2333_v17  ;;  %v68_v41 = vld [vmem:[#allocation7 + $0xb0] sm:$0xff]  ;;  %v78_v43 = vld [vmem:[#allocation7 + $0x100] sm:$0xff]  ;;  %v2355_v45 = vpack.c.bf16 %v69_v39, %v65_v38  ;;  %v2358_v46 = vpack.c.bf16 %v83_v36, %v79_v35  ;;  %v87_v47 = vld [vmem:[#allocation7 + $0x148] sm:$0xff] }
  0x31   :  { %v82_v44 = vld [vmem:[#allocation7 + $0x120] sm:$0xff]  ;;  %1596 = vmatpush1.bf16.msra.mxu1 %v2349_v37  ;;  %v2361_v48 = vpack.c.bf16 %v68_v41, %v64_v40  ;;  %v73_v49 = vld [vmem:[#allocation7 + $0xd8] sm:$0xff]  ;;  %v91_v51 = vld [vmem:[#allocation7 + $0x168] sm:$0xff] }
  0x32   :  { %v77_v50 = vld [vmem:[#allocation7 + $0xf8] sm:$0xff]  ;;  %1598 = vmatprep.subr.bf16.mxu1 %v2355_v45  ;;  %v72_v53 = vld [vmem:[#allocation7 + $0xd0] sm:$0xff]  ;;  %v2367_v55 = vpack.c.bf16 %v82_v44, %v78_v43  ;;  %v2370_v58 = vpack.c.bf16 %v91_v51, %v87_v47  ;;  %v86_v59 = vld [vmem:[#allocation7 + $0x140] sm:$0xff] }
  0x33   :  { %1568 = vmatpush1.bf16.msra.mxu0 %v2340_v26  ;;  %v2364_v52 = vpack.c.bf16 %v77_v50, %v73_v49  ;;  %v76_v54 = vld [vmem:[#allocation7 + $0xf0] sm:$0xff]  ;;  %v81_v56 = vld [vmem:[#allocation7 + $0x118] sm:$0xff]  ;;  %v90_v60 = vld [vmem:[#allocation7 + $0x160] sm:$0xff] }
  0x34   :  { %1570 = vmatprep.subr.bf16.mxu0 %v2344_v30  ;;  %v85_v57 = vld [vmem:[#allocation7 + $0x138] sm:$0xff]  ;;  %v95_v61 = vld [vmem:[#allocation7 + $0x188] sm:$0xff]  ;;  %v2373_v62 = vpack.c.bf16 %v76_v54, %v72_v53  ;;  %v80_v2 = vld [vmem:[#allocation7 + $0x110] sm:$0xff]  ;;  %v2379_v7 = vpack.c.bf16 %v90_v60, %v86_v59 }
  0x35   :  { %1600 = vmatpush1.bf16.msra.mxu1 %v2361_v48  ;;  %v99_v63 = vld [vmem:[#allocation7 + $0x1a8] sm:$0xff]  ;;  %v2376_v1 = vpack.c.bf16 %v85_v57, %v81_v56  ;;  %v84_v3 = vld [vmem:[#allocation7 + $0x130] sm:$0xff]  ;;  %v89_v5 = vld [vmem:[#allocation7 + $0x158] sm:$0xff] }
  0x36   :  { %1602 = vmatprep.subr.bf16.mxu1 %v2364_v52  ;;  %v93_v6 = vld [vmem:[#allocation7 + $0x178] sm:$0xff]  ;;  %v2382_v10 = vpack.c.bf16 %v99_v63, %v95_v61  ;;  %v94_v11 = vld [vmem:[#allocation7 + $0x180] sm:$0xff]  ;;  %v103_v13 = vld [vmem:[#allocation7 + $0x1c8] sm:$0xff]  ;;  %v2385_v15 = vpack.c.bf16 %v84_v3, %v80_v2 }
  0x37   :  { %1572 = vmatpush1.bf16.msra.mxu0 %v2353_v42  ;;  %v98_v12 = vld [vmem:[#allocation7 + $0x1a0] sm:$0xff]  ;;  %v107_v16 = vld [vmem:[#allocation7 + $0x1e8] sm:$0xff]  ;;  %v2388_v18 = vpack.c.bf16 %v93_v6, %v89_v5  ;;  %v88_v19 = vld [vmem:[#allocation7 + $0x150] sm:$0xff] }
  0x38   :  { %1574 = vmatprep.subr.bf16.mxu0 %v2358_v46  ;;  %v92_v20 = vld [vmem:[#allocation7 + $0x170] sm:$0xff]  ;;  %v97_v21 = vld [vmem:[#allocation7 + $0x198] sm:$0xff]  ;;  %v2391_v24 = vpack.c.bf16 %v98_v12, %v94_v11  ;;  %v2394_v27 = vpack.c.bf16 %v107_v16, %v103_v13  ;;  %v102_v28 = vld [vmem:[#allocation7 + $0x1c0] sm:$0xff] }
  0x39   :  { %1604 = vmatpush1.bf16.msra.mxu1 %v2373_v62  ;;  %v101_v23 = vld [vmem:[#allocation7 + $0x1b8] sm:$0xff]  ;;  %v106_v29 = vld [vmem:[#allocation7 + $0x1e0] sm:$0xff]  ;;  %v2397_v31 = vpack.c.bf16 %v92_v20, %v88_v19  ;;  %v96_v34 = vld [vmem:[#allocation7 + $0x190] sm:$0xff] }
  0x3a   :  { %1606 = vmatprep.subr.bf16.mxu1 %v2376_v1  ;;  %v2400_v32 = vpack.c.bf16 %v101_v23, %v97_v21  ;;  %v100_v35 = vld [vmem:[#allocation7 + $0x1b0] sm:$0xff]  ;;  %v105_v36 = vld [vmem:[#allocation7 + $0x1d8] sm:$0xff]  ;;  %v2403_v39 = vpack.c.bf16 %v106_v29, %v102_v28  ;;  %v112_v49 = vld [vmem:[#allocation4] sm:$0xff] }
  0x3b   :  { %1576 = vmatpush1.bf16.msra.mxu0 %v2367_v55  ;;  %v109_v38 = vld [vmem:[#allocation7 + $0x1f8] sm:$0xff]  ;;  %v2407_v40 = vpack.c.bf16 %v100_v35, %v96_v34  ;;  %v104_v43 = vld [vmem:[#allocation7 + $0x1d0] sm:$0xff]  ;;  %v113_v50 = vld [vmem:[#allocation4 + $0x8] sm:$0xff] }
  0x3c   :  { %1578 = vmatprep.subr.bf16.mxu0 %v2370_v58  ;;  %v2410_v41 = vpack.c.bf16 %v109_v38, %v105_v36  ;;  %v108_v44 = vld [vmem:[#allocation7 + $0x1f0] sm:$0xff]  ;;  %v115_v60 = vld [vmem:[#allocation4 + $0x18] sm:$0xff] }
  0x3d   :  { %1608 = vmatpush1.bf16.msra.mxu1 %v2385_v15  ;;  %v2414_v47 = vpack.c.bf16 %v108_v44, %v104_v43  ;;  %v114_v3 = vld [vmem:[#allocation4 + $0x10] sm:$0xff]  ;;  %v287_v44 = vld [vmem:[#allocation4 + $0x20] sm:$0xff] }
  0x3e   :  { %1610 = vmatprep.subr.bf16.mxu1 %v2388_v18 }
  0x3f   :  { %1580 = vmatpush1.bf16.msra.mxu0 %v2379_v7 }
  0x40   :  { %1582 = vmatprep.subr.bf16.mxu0 %v2382_v10 }
  0x41   :  { %1612 = vmatpush1.bf16.msra.mxu1 %v2397_v31 }
  0x42   :  { %1614 = vmatprep.subr.bf16.mxu1 %v2400_v32 }
  0x43   :  { %1584 = vmatpush1.bf16.msra.mxu0 %v2391_v24 }
  0x44   :  { %1586 = vmatprep.subr.bf16.mxu0 %v2394_v27 }
  0x45   :  { %1616 = vmatpush1.bf16.msra.mxu1 %v2407_v40 }
  0x46   :  { %1618 = vmatprep.subr.bf16.mxu1 %v2410_v41 }
  0x47   :  { %1588 = vmatpush1.bf16.msra.mxu0 %v2403_v39 }
  0x48   :  { %1622 = vmatprep.subr.bf16.mxu0 %v2322_v4 }
  0x49   :  { %1620 = vmatpush1.bf16.msra.mxu1 %v2414_v47 }
  0x4a   :  { %181 = vmatmul.mubr.f32.vlgmr.msra.gmra.mrb[0].mxu0 %v2279_v0  ;;  %1654 = vmatprep.subr.bf16.mxu1 %v2335_v22 }
  0x4b   :  { %1624 = vmatpush1.bf16.msra.mxu0 %v2324_v8  ;;  %355 = vmatprep.mubr.f32.mxu0 %v2279_v0 }
  0x4c   :  { %1626 = vmatprep.subr.bf16.mxu0 %v2326_v9  ;;  %252 = vmatmul.mubr.f32.vlgmr.msra.gmra.mrb[0].mxu1 %v2279_v0 }
  0x4d   :  { %1656 = vmatpush1.bf16.msra.mxu1 %v2337_v25  ;;  %426 = vmatprep.mubr.f32.mxu1 %v2279_v0 }
  0x4e   :  { %1658 = vmatprep.subr.bf16.mxu1 %v2347_v33 }
  0x4f   :  { %1628 = vmatpush1.bf16.msra.mxu0 %v2330_v14 }
  0x50   :  { %1630 = vmatprep.subr.bf16.mxu0 %v2333_v17 }
  0x51   :  { %1660 = vmatpush1.bf16.msra.mxu1 %v2349_v37 }
  0x52   :  { %1662 = vmatprep.subr.bf16.mxu1 %v2355_v45 }
  0x53   :  { %1632 = vmatpush1.bf16.msra.mxu0 %v2340_v26 }
  0x54   :  { %1634 = vmatprep.subr.bf16.mxu0 %v2344_v30 }
  0x55   :  { %1664 = vmatpush1.bf16.msra.mxu1 %v2361_v48 }
  0x56   :  { %1666 = vmatprep.subr.bf16.mxu1 %v2364_v52 }
  0x57   :  { %1636 = vmatpush1.bf16.msra.mxu0 %v2353_v42 }
  0x58   :  { %1638 = vmatprep.subr.bf16.mxu0 %v2358_v46 }
  0x59   :  { %1668 = vmatpush1.bf16.msra.mxu1 %v2373_v62 }
  0x5a   :  { %1670 = vmatprep.subr.bf16.mxu1 %v2376_v1 }
  0x5b   :  { %1640 = vmatpush1.bf16.msra.mxu0 %v2367_v55 }
  0x5c   :  { %1642 = vmatprep.subr.bf16.mxu0 %v2370_v58 }
  0x5d   :  { %1672 = vmatpush1.bf16.msra.mxu1 %v2385_v15 }
  0x5e   :  { %1674 = vmatprep.subr.bf16.mxu1 %v2388_v18 }
  0x5f   :  { %1644 = vmatpush1.bf16.msra.mxu0 %v2379_v7 }
  0x60   :  { %1646 = vmatprep.subr.bf16.mxu0 %v2382_v10 }
  0x61   :  { %1676 = vmatpush1.bf16.msra.mxu1 %v2397_v31 }
  0x62   :  { %1678 = vmatprep.subr.bf16.mxu1 %v2400_v32 }
  0x63   :  { %1648 = vmatpush1.bf16.msra.mxu0 %v2391_v24 }
  0x64   :  { %1650 = vmatprep.subr.bf16.mxu0 %v2394_v27 }
  0x65   :  { %1680 = vmatpush1.bf16.msra.mxu1 %v2407_v40 }
  0x66   :  { %1682 = vmatprep.subr.bf16.mxu1 %v2410_v41 }
  0x67   :  { %1652 = vmatpush1.bf16.msra.mxu0 %v2403_v39 }
  0x68   :  { %1686 = vmatprep.subr.bf16.mxu0 %v2322_v4 }
  0x69   :  { %1684 = vmatpush1.bf16.msra.mxu1 %v2414_v47 }
  0x6a   :  { %1718 = vmatprep.subr.bf16.mxu1 %v2335_v22 }
 0x11d   :  { %v182_v51 = vpop.f32.mrb[0].mxu0 }
 0x11e   :  { %v258_v53 = vadd.f32 %v182_v51, %v112_v49  ;;  %v184_v54 = vpop.f32.mrb[1].mxu0  ;;  %v288_v49 = vld [vmem:[#allocation4 + $0x28] sm:$0xff] }
 0x11f   :  { %v259_v56 = vadd.f32 %v184_v54, %v113_v50  ;;  %v253_v61 = vpop.f32.mrb[0].mxu1 }
 0x120   :  { %v1533_v57 = vmul.f32 -1.442695, %v258_v53  ;;  %v255_v63 = vpop.f32.mrb[1].mxu1  ;;  %v260_v6 = vadd.f32 %v253_v61, %v114_v3  ;;  %v290_v61 = vld [vmem:[#allocation4 + $0x38] sm:$0xff] }
 0x121   :  { %v1534_v59 = vmul.f32 -1.442695, %v259_v56  ;;  %v261_v2 = vadd.f32 %v255_v63, %v115_v60 }
 0x122   :  { %2075 = vpow2.f32 %v1533_v57 }
 0x123   :  { %2077 = vpow2.f32 %v1534_v59  ;;  %v1535_v5 = vmul.f32 -1.442695, %v261_v2  ;;  %v289_v2 = vld [vmem:[#allocation4 + $0x30] sm:$0xff] }
 0x125   :  { %2079 = vpow2.f32 %v1535_v5 }
 0x126   :  { %2081 = vtanh.f32 %v260_v6 }
 0x12c   :  { %v2076_v11 = vpop.eup %2075 }
 0x12d   :  { %v2078_v12 = vpop.eup %2077  ;;  %v265_v13 = vadd.f32 1.0, %v2076_v11 }
 0x12e   :  { %v271_v16 = vadd.f32 1.0, %v2078_v12 }
 0x12f   :  { %2083 = vrcp.f32 %v265_v13  ;;  %v2080_v19 = vpop.eup %2079 }
 0x130   :  { %2085 = vrcp.f32 %v271_v16  ;;  %v2082_v20 = vpop.eup %2081  ;;  %v278_v23 = vadd.f32 1.0, %v2080_v19 }
 0x132   :  { %2087 = vrcp.f32 %v278_v23 }
 0x139   :  { %v2084_v21 = vpop.eup %2083 }
 0x13a   :  { %v2086_v28 = vpop.eup %2085  ;;  %v282_v29 = vmul.f32 %v2084_v21, %v2082_v20 }
 0x13b   :  { %v281_v34 = vmul.f32 0.0, %v2086_v28 }
 0x13c   :  { %v2088_v36 = vpop.eup %2087 }
 0x13d   :  { %v2456_v35 = vadd.f32 %v282_v29, %v281_v34 }
 0x13f   :  { %2089 = vtanh.f32 %v2456_v35 }
 0x149   :  { %v2090_v38 = vpop.eup %2089 }
 0x14a   :  { %v285_v43 = vmul.f32 %v2090_v38, %v2088_v36 }
 0x14c   :  { %356 = vmatmul.mubr.f32.vlgmr.msra.gmra.mrb[2].mxu0 %v285_v43  ;;  %427 = vmatmul.mubr.f32.vlgmr.msra.gmra.mrb[2].mxu1 %v285_v43 }
 0x14d   :  { %1688 = vmatpush1.bf16.msra.mxu0 %v2324_v8  ;;  %1720 = vmatpush1.bf16.msra.mxu1 %v2337_v25 }
 0x14e   :  { %1690 = vmatprep.subr.bf16.mxu0 %v2326_v9  ;;  %1722 = vmatprep.subr.bf16.mxu1 %v2347_v33 }
 0x14f   :  { %530 = vmatprep.mubr.f32.mxu0 %v2279_v0  ;;  %601 = vmatprep.mubr.f32.mxu1 %v2279_v0 }
 0x151   :  { %1692 = vmatpush1.bf16.msra.mxu0 %v2330_v14  ;;  %1724 = vmatpush1.bf16.msra.mxu1 %v2349_v37 }
 0x152   :  { %1694 = vmatprep.subr.bf16.mxu0 %v2333_v17  ;;  %1726 = vmatprep.subr.bf16.mxu1 %v2355_v45 }
 0x155   :  { %1696 = vmatpush1.bf16.msra.mxu0 %v2340_v26  ;;  %1728 = vmatpush1.bf16.msra.mxu1 %v2361_v48 }
 0x156   :  { %1698 = vmatprep.subr.bf16.mxu0 %v2344_v30  ;;  %1730 = vmatprep.subr.bf16.mxu1 %v2364_v52 }
 0x159   :  { %1700 = vmatpush1.bf16.msra.mxu0 %v2353_v42  ;;  %1732 = vmatpush1.bf16.msra.mxu1 %v2373_v62 }
 0x15a   :  { %1702 = vmatprep.subr.bf16.mxu0 %v2358_v46  ;;  %1734 = vmatprep.subr.bf16.mxu1 %v2376_v1 }
 0x15d   :  { %1704 = vmatpush1.bf16.msra.mxu0 %v2367_v55  ;;  %1736 = vmatpush1.bf16.msra.mxu1 %v2385_v15 }
 0x15e   :  { %1706 = vmatprep.subr.bf16.mxu0 %v2370_v58  ;;  %1738 = vmatprep.subr.bf16.mxu1 %v2388_v18 }
 0x161   :  { %1708 = vmatpush1.bf16.msra.mxu0 %v2379_v7  ;;  %1740 = vmatpush1.bf16.msra.mxu1 %v2397_v31 }
 0x162   :  { %1710 = vmatprep.subr.bf16.mxu0 %v2382_v10  ;;  %1742 = vmatprep.subr.bf16.mxu1 %v2400_v32 }
 0x165   :  { %1712 = vmatpush1.bf16.msra.mxu0 %v2391_v24  ;;  %1744 = vmatpush1.bf16.msra.mxu1 %v2407_v40 }
 0x166   :  { %1714 = vmatprep.subr.bf16.mxu0 %v2394_v27  ;;  %1746 = vmatprep.subr.bf16.mxu1 %v2410_v41 }
 0x169   :  { %1716 = vmatpush1.bf16.msra.mxu0 %v2403_v39  ;;  %1748 = vmatpush1.bf16.msra.mxu1 %v2414_v47 }
 0x16a   :  { %1750 = vmatprep.subr.bf16.mxu0 %v2322_v4  ;;  %1782 = vmatprep.subr.bf16.mxu1 %v2335_v22 }
 0x21f   :  { %v357_v50 = vpop.f32.mrb[2].mxu0  ;;  %v428_v51 = vpop.f32.mrb[2].mxu1 }
 0x220   :  { %v433_v53 = vadd.f32 %v357_v50, %v287_v44  ;;  %v359_v54 = vpop.f32.mrb[3].mxu0  ;;  %v430_v56 = vpop.f32.mrb[3].mxu1  ;;  %v435_v5 = vadd.f32 %v428_v51, %v289_v2  ;;  %v463_v44 = vld [vmem:[#allocation4 + $0x48] sm:$0xff] }
 0x221   :  { %v434_v57 = vadd.f32 %v359_v54, %v288_v49  ;;  %v436_v63 = vadd.f32 %v430_v56, %v290_v61 }
 0x222   :  { %v1536_v59 = vmul.f32 -1.442695, %v433_v53 }
 0x223   :  { %v1537_v60 = vmul.f32 -1.442695, %v434_v57  ;;  %v1538_v3 = vmul.f32 -1.442695, %v436_v63  ;;  %v464_v63 = vld [vmem:[#allocation4 + $0x50] sm:$0xff] }
 0x224   :  { %2091 = vpow2.f32 %v1536_v59 }
 0x225   :  { %2093 = vpow2.f32 %v1537_v60  ;;  %v465_v60 = vld [vmem:[#allocation4 + $0x58] sm:$0xff] }
 0x226   :  { %2095 = vpow2.f32 %v1538_v3 }
 0x227   :  { %2097 = vtanh.f32 %v435_v5 }
 0x22e   :  { %v2092_v6 = vpop.eup %2091 }
 0x22f   :  { %v2094_v11 = vpop.eup %2093  ;;  %v440_v12 = vadd.f32 1.0, %v2092_v6 }
 0x230   :  { %v446_v13 = vadd.f32 1.0, %v2094_v11  ;;  %v2096_v16 = vpop.eup %2095 }
 0x231   :  { %2099 = vrcp.f32 %v440_v12  ;;  %v2098_v19 = vpop.eup %2097  ;;  %v453_v28 = vadd.f32 1.0, %v2096_v16 }
 0x232   :  { %2101 = vrcp.f32 %v446_v13 }
 0x233   :  { %2103 = vrcp.f32 %v453_v28 }
 0x23b   :  { %v2100_v20 = vpop.eup %2099 }
 0x23c   :  { %v2102_v21 = vpop.eup %2101  ;;  %v457_v23 = vmul.f32 %v2100_v20, %v2098_v19 }
 0x23d   :  { %v456_v29 = vmul.f32 %v2102_v21, %v2456_v35  ;;  %v2104_v36 = vpop.eup %2103  ;;  %v462_v35 = vld [vmem:[#allocation4 + $0x40] sm:$0xff] }
 0x23f   :  { %v2494_v34 = vadd.f32 %v457_v23, %v456_v29 }
 0x241   :  { %2105 = vtanh.f32 %v2494_v34 }
 0x24b   :  { %v2106_v38 = vpop.eup %2105 }
 0x24c   :  { %v460_v43 = vmul.f32 %v2106_v38, %v2104_v36 }
 0x24e   :  { %531 = vmatmul.mubr.f32.vlgmr.msra.gmra.mrb[4].mxu0 %v460_v43  ;;  %602 = vmatmul.mubr.f32.vlgmr.msra.gmra.mrb[4].mxu1 %v460_v43 }
 0x24f   :  { %1752 = vmatpush1.bf16.msra.mxu0 %v2324_v8  ;;  %1784 = vmatpush1.bf16.msra.mxu1 %v2337_v25 }
 0x250   :  { %1754 = vmatprep.subr.bf16.mxu0 %v2326_v9  ;;  %1786 = vmatprep.subr.bf16.mxu1 %v2347_v33 }
 0x251   :  { %705 = vmatprep.mubr.f32.mxu0 %v2279_v0  ;;  %776 = vmatprep.mubr.f32.mxu1 %v2279_v0 }
 0x253   :  { %1756 = vmatpush1.bf16.msra.mxu0 %v2330_v14  ;;  %1788 = vmatpush1.bf16.msra.mxu1 %v2349_v37 }
 0x254   :  { %1758 = vmatprep.subr.bf16.mxu0 %v2333_v17  ;;  %1790 = vmatprep.subr.bf16.mxu1 %v2355_v45 }
 0x257   :  { %1760 = vmatpush1.bf16.msra.mxu0 %v2340_v26  ;;  %1792 = vmatpush1.bf16.msra.mxu1 %v2361_v48 }
 0x258   :  { %1762 = vmatprep.subr.bf16.mxu0 %v2344_v30  ;;  %1794 = vmatprep.subr.bf16.mxu1 %v2364_v52 }
 0x25b   :  { %1764 = vmatpush1.bf16.msra.mxu0 %v2353_v42  ;;  %1796 = vmatpush1.bf16.msra.mxu1 %v2373_v62 }
 0x25c   :  { %1766 = vmatprep.subr.bf16.mxu0 %v2358_v46  ;;  %1798 = vmatprep.subr.bf16.mxu1 %v2376_v1 }
 0x25f   :  { %1768 = vmatpush1.bf16.msra.mxu0 %v2367_v55  ;;  %1800 = vmatpush1.bf16.msra.mxu1 %v2385_v15 }
 0x260   :  { %1770 = vmatprep.subr.bf16.mxu0 %v2370_v58  ;;  %1802 = vmatprep.subr.bf16.mxu1 %v2388_v18 }
 0x263   :  { %1772 = vmatpush1.bf16.msra.mxu0 %v2379_v7  ;;  %1804 = vmatpush1.bf16.msra.mxu1 %v2397_v31 }
 0x264   :  { %1774 = vmatprep.subr.bf16.mxu0 %v2382_v10  ;;  %1806 = vmatprep.subr.bf16.mxu1 %v2400_v32 }
 0x267   :  { %1776 = vmatpush1.bf16.msra.mxu0 %v2391_v24  ;;  %1808 = vmatpush1.bf16.msra.mxu1 %v2407_v40 }
 0x268   :  { %1778 = vmatprep.subr.bf16.mxu0 %v2394_v27  ;;  %1810 = vmatprep.subr.bf16.mxu1 %v2410_v41 }
 0x26b   :  { %1780 = vmatpush1.bf16.msra.mxu0 %v2403_v39  ;;  %1812 = vmatpush1.bf16.msra.mxu1 %v2414_v47 }
 0x26c   :  { %1814 = vmatprep.subr.bf16.mxu0 %v2322_v4  ;;  %1846 = vmatprep.subr.bf16.mxu1 %v2335_v22 }
 0x321   :  { %v532_v49 = vpop.f32.mrb[4].mxu0  ;;  %v603_v50 = vpop.f32.mrb[4].mxu1 }
 0x322   :  { %v608_v51 = vadd.f32 %v532_v49, %v462_v35  ;;  %v534_v53 = vpop.f32.mrb[5].mxu0  ;;  %v605_v54 = vpop.f32.mrb[5].mxu1  ;;  %v610_v3 = vadd.f32 %v603_v50, %v464_v63  ;;  %v638_v35 = vld [vmem:[#allocation4 + $0x68] sm:$0xff] }
 0x323   :  { %v609_v56 = vadd.f32 %v534_v53, %v463_v44  ;;  %v611_v61 = vadd.f32 %v605_v54, %v465_v60 }
 0x324   :  { %v1539_v57 = vmul.f32 -1.442695, %v608_v51 }
 0x325   :  { %v1540_v59 = vmul.f32 -1.442695, %v609_v56  ;;  %v1541_v2 = vmul.f32 -1.442695, %v611_v61  ;;  %v639_v61 = vld [vmem:[#allocation4 + $0x70] sm:$0xff] }
 0x326   :  { %2107 = vpow2.f32 %v1539_v57 }
 0x327   :  { %2109 = vpow2.f32 %v1540_v59  ;;  %v640_v59 = vld [vmem:[#allocation4 + $0x78] sm:$0xff] }
 0x328   :  { %2111 = vpow2.f32 %v1541_v2 }
 0x329   :  { %2113 = vtanh.f32 %v610_v3 }
 0x330   :  { %v2108_v5 = vpop.eup %2107 }
 0x331   :  { %v2110_v6 = vpop.eup %2109  ;;  %v615_v11 = vadd.f32 1.0, %v2108_v5 }
 0x332   :  { %v621_v12 = vadd.f32 1.0, %v2110_v6  ;;  %v2112_v13 = vpop.eup %2111 }
 0x333   :  { %2115 = vrcp.f32 %v615_v11  ;;  %v2114_v16 = vpop.eup %2113  ;;  %v628_v23 = vadd.f32 1.0, %v2112_v13 }
 0x334   :  { %2117 = vrcp.f32 %v621_v12 }
 0x335   :  { %2119 = vrcp.f32 %v628_v23 }
 0x33d   :  { %v2116_v19 = vpop.eup %2115 }
 0x33e   :  { %v2118_v20 = vpop.eup %2117  ;;  %v632_v21 = vmul.f32 %v2116_v19, %v2114_v16 }
 0x33f   :  { %v631_v28 = vmul.f32 %v2118_v20, %v2494_v34  ;;  %v2120_v36 = vpop.eup %2119  ;;  %v637_v34 = vld [vmem:[#allocation4 + $0x60] sm:$0xff] }
 0x341   :  { %v2532_v29 = vadd.f32 %v632_v21, %v631_v28 }
 0x343   :  { %2121 = vtanh.f32 %v2532_v29 }
 0x34d   :  { %v2122_v38 = vpop.eup %2121 }
 0x34e   :  { %v635_v43 = vmul.f32 %v2122_v38, %v2120_v36 }
 0x350   :  { %706 = vmatmul.mubr.f32.vlgmr.msra.gmra.mrb[6].mxu0 %v635_v43  ;;  %777 = vmatmul.mubr.f32.vlgmr.msra.gmra.mrb[6].mxu1 %v635_v43 }
 0x351   :  { %1816 = vmatpush1.bf16.msra.mxu0 %v2324_v8  ;;  %1848 = vmatpush1.bf16.msra.mxu1 %v2337_v25 }
 0x352   :  { %1818 = vmatprep.subr.bf16.mxu0 %v2326_v9  ;;  %1850 = vmatprep.subr.bf16.mxu1 %v2347_v33 }
 0x353   :  { %880 = vmatprep.mubr.f32.mxu0 %v2279_v0  ;;  %951 = vmatprep.mubr.f32.mxu1 %v2279_v0 }
 0x355   :  { %1820 = vmatpush1.bf16.msra.mxu0 %v2330_v14  ;;  %1852 = vmatpush1.bf16.msra.mxu1 %v2349_v37 }
 0x356   :  { %1822 = vmatprep.subr.bf16.mxu0 %v2333_v17  ;;  %1854 = vmatprep.subr.bf16.mxu1 %v2355_v45 }
 0x359   :  { %1824 = vmatpush1.bf16.msra.mxu0 %v2340_v26  ;;  %1856 = vmatpush1.bf16.msra.mxu1 %v2361_v48 }
 0x35a   :  { %1826 = vmatprep.subr.bf16.mxu0 %v2344_v30  ;;  %1858 = vmatprep.subr.bf16.mxu1 %v2364_v52 }
 0x35d   :  { %1828 = vmatpush1.bf16.msra.mxu0 %v2353_v42  ;;  %1860 = vmatpush1.bf16.msra.mxu1 %v2373_v62 }
 0x35e   :  { %1830 = vmatprep.subr.bf16.mxu0 %v2358_v46  ;;  %1862 = vmatprep.subr.bf16.mxu1 %v2376_v1 }
 0x361   :  { %1832 = vmatpush1.bf16.msra.mxu0 %v2367_v55  ;;  %1864 = vmatpush1.bf16.msra.mxu1 %v2385_v15 }
 0x362   :  { %1834 = vmatprep.subr.bf16.mxu0 %v2370_v58  ;;  %1866 = vmatprep.subr.bf16.mxu1 %v2388_v18 }
 0x365   :  { %1836 = vmatpush1.bf16.msra.mxu0 %v2379_v7  ;;  %1868 = vmatpush1.bf16.msra.mxu1 %v2397_v31 }
 0x366   :  { %1838 = vmatprep.subr.bf16.mxu0 %v2382_v10  ;;  %1870 = vmatprep.subr.bf16.mxu1 %v2400_v32 }
 0x369   :  { %1840 = vmatpush1.bf16.msra.mxu0 %v2391_v24  ;;  %1872 = vmatpush1.bf16.msra.mxu1 %v2407_v40 }
 0x36a   :  { %1842 = vmatprep.subr.bf16.mxu0 %v2394_v27  ;;  %1874 = vmatprep.subr.bf16.mxu1 %v2410_v41 }
 0x36d   :  { %1844 = vmatpush1.bf16.msra.mxu0 %v2403_v39  ;;  %1876 = vmatpush1.bf16.msra.mxu1 %v2414_v47 }
 0x36e   :  { %1878 = vmatprep.subr.bf16.mxu0 %v2322_v4  ;;  %1910 = vmatprep.subr.bf16.mxu1 %v2335_v22 }
 0x423   :  { %v707_v44 = vpop.f32.mrb[6].mxu0  ;;  %v778_v49 = vpop.f32.mrb[6].mxu1 }
 0x424   :  { %v783_v50 = vadd.f32 %v707_v44, %v637_v34  ;;  %v709_v51 = vpop.f32.mrb[7].mxu0  ;;  %v780_v53 = vpop.f32.mrb[7].mxu1  ;;  %v785_v2 = vadd.f32 %v778_v49, %v639_v61  ;;  %v813_v34 = vld [vmem:[#allocation4 + $0x88] sm:$0xff] }
 0x425   :  { %v784_v54 = vadd.f32 %v709_v51, %v638_v35  ;;  %v786_v60 = vadd.f32 %v780_v53, %v640_v59 }
 0x426   :  { %v1542_v56 = vmul.f32 -1.442695, %v783_v50 }
 0x427   :  { %v1543_v57 = vmul.f32 -1.442695, %v784_v54  ;;  %v1544_v63 = vmul.f32 -1.442695, %v786_v60  ;;  %v814_v60 = vld [vmem:[#allocation4 + $0x90] sm:$0xff] }
 0x428   :  { %2123 = vpow2.f32 %v1542_v56 }
 0x429   :  { %2125 = vpow2.f32 %v1543_v57  ;;  %v815_v57 = vld [vmem:[#allocation4 + $0x98] sm:$0xff] }
 0x42a   :  { %2127 = vpow2.f32 %v1544_v63 }
 0x42b   :  { %2129 = vtanh.f32 %v785_v2 }
 0x432   :  { %v2124_v3 = vpop.eup %2123 }
 0x433   :  { %v2126_v5 = vpop.eup %2125  ;;  %v790_v6 = vadd.f32 1.0, %v2124_v3 }
 0x434   :  { %v796_v11 = vadd.f32 1.0, %v2126_v5  ;;  %v2128_v12 = vpop.eup %2127 }
 0x435   :  { %2131 = vrcp.f32 %v790_v6  ;;  %v2130_v13 = vpop.eup %2129  ;;  %v803_v21 = vadd.f32 1.0, %v2128_v12 }
 0x436   :  { %2133 = vrcp.f32 %v796_v11 }
 0x437   :  { %2135 = vrcp.f32 %v803_v21 }
 0x43f   :  { %v2132_v16 = vpop.eup %2131 }
 0x440   :  { %v2134_v19 = vpop.eup %2133  ;;  %v807_v20 = vmul.f32 %v2132_v16, %v2130_v13 }
 0x441   :  { %v806_v23 = vmul.f32 %v2134_v19, %v2532_v29  ;;  %v2136_v36 = vpop.eup %2135  ;;  %v812_v29 = vld [vmem:[#allocation4 + $0x80] sm:$0xff] }
 0x443   :  { %v2570_v28 = vadd.f32 %v807_v20, %v806_v23 }
 0x445   :  { %2137 = vtanh.f32 %v2570_v28 }
 0x44f   :  { %v2138_v38 = vpop.eup %2137 }
 0x450   :  { %v810_v43 = vmul.f32 %v2138_v38, %v2136_v36 }
 0x452   :  { %881 = vmatmul.mubr.f32.vlgmr.msra.gmra.mrb[8].mxu0 %v810_v43  ;;  %952 = vmatmul.mubr.f32.vlgmr.msra.gmra.mrb[8].mxu1 %v810_v43 }
 0x453   :  { %1880 = vmatpush1.bf16.msra.mxu0 %v2324_v8  ;;  %1912 = vmatpush1.bf16.msra.mxu1 %v2337_v25 }
 0x454   :  { %1882 = vmatprep.subr.bf16.mxu0 %v2326_v9  ;;  %1914 = vmatprep.subr.bf16.mxu1 %v2347_v33 }
 0x455   :  { %1055 = vmatprep.mubr.f32.mxu0 %v2279_v0  ;;  %1126 = vmatprep.mubr.f32.mxu1 %v2279_v0 }
 0x457   :  { %1884 = vmatpush1.bf16.msra.mxu0 %v2330_v14  ;;  %1916 = vmatpush1.bf16.msra.mxu1 %v2349_v37 }
 0x458   :  { %1886 = vmatprep.subr.bf16.mxu0 %v2333_v17  ;;  %1918 = vmatprep.subr.bf16.mxu1 %v2355_v45 }
 0x45b   :  { %1888 = vmatpush1.bf16.msra.mxu0 %v2340_v26  ;;  %1920 = vmatpush1.bf16.msra.mxu1 %v2361_v48 }
 0x45c   :  { %1890 = vmatprep.subr.bf16.mxu0 %v2344_v30  ;;  %1922 = vmatprep.subr.bf16.mxu1 %v2364_v52 }
 0x45f   :  { %1892 = vmatpush1.bf16.msra.mxu0 %v2353_v42  ;;  %1924 = vmatpush1.bf16.msra.mxu1 %v2373_v62 }
 0x460   :  { %1894 = vmatprep.subr.bf16.mxu0 %v2358_v46  ;;  %1926 = vmatprep.subr.bf16.mxu1 %v2376_v1 }
 0x463   :  { %1896 = vmatpush1.bf16.msra.mxu0 %v2367_v55  ;;  %1928 = vmatpush1.bf16.msra.mxu1 %v2385_v15 }
 0x464   :  { %1898 = vmatprep.subr.bf16.mxu0 %v2370_v58  ;;  %1930 = vmatprep.subr.bf16.mxu1 %v2388_v18 }
 0x467   :  { %1900 = vmatpush1.bf16.msra.mxu0 %v2379_v7  ;;  %1932 = vmatpush1.bf16.msra.mxu1 %v2397_v31 }
 0x468   :  { %1902 = vmatprep.subr.bf16.mxu0 %v2382_v10  ;;  %1934 = vmatprep.subr.bf16.mxu1 %v2400_v32 }
 0x46b   :  { %1904 = vmatpush1.bf16.msra.mxu0 %v2391_v24  ;;  %1936 = vmatpush1.bf16.msra.mxu1 %v2407_v40 }
 0x46c   :  { %1906 = vmatprep.subr.bf16.mxu0 %v2394_v27  ;;  %1938 = vmatprep.subr.bf16.mxu1 %v2410_v41 }
 0x46f   :  { %1908 = vmatpush1.bf16.msra.mxu0 %v2403_v39  ;;  %1940 = vmatpush1.bf16.msra.mxu1 %v2414_v47 }
 0x470   :  { %1942 = vmatprep.subr.bf16.mxu0 %v2322_v4  ;;  %1974 = vmatprep.subr.bf16.mxu1 %v2335_v22 }
 0x525   :  { %v882_v35 = vpop.f32.mrb[8].mxu0  ;;  %v953_v44 = vpop.f32.mrb[8].mxu1 }
 0x526   :  { %v958_v49 = vadd.f32 %v882_v35, %v812_v29  ;;  %v884_v50 = vpop.f32.mrb[9].mxu0  ;;  %v955_v51 = vpop.f32.mrb[9].mxu1  ;;  %v960_v63 = vadd.f32 %v953_v44, %v814_v60  ;;  %v988_v29 = vld [vmem:[#allocation4 + $0xa8] sm:$0xff] }
 0x527   :  { %v959_v53 = vadd.f32 %v884_v50, %v813_v34  ;;  %v961_v59 = vadd.f32 %v955_v51, %v815_v57 }
 0x528   :  { %v1545_v54 = vmul.f32 -1.442695, %v958_v49 }
 0x529   :  { %v1546_v56 = vmul.f32 -1.442695, %v959_v53  ;;  %v1547_v61 = vmul.f32 -1.442695, %v961_v59  ;;  %v989_v59 = vld [vmem:[#allocation4 + $0xb0] sm:$0xff] }
 0x52a   :  { %2139 = vpow2.f32 %v1545_v54 }
 0x52b   :  { %2141 = vpow2.f32 %v1546_v56  ;;  %v990_v56 = vld [vmem:[#allocation4 + $0xb8] sm:$0xff] }
 0x52c   :  { %2143 = vpow2.f32 %v1547_v61 }
 0x52d   :  { %2145 = vtanh.f32 %v960_v63 }
 0x534   :  { %v2140_v2 = vpop.eup %2139 }
 0x535   :  { %v2142_v3 = vpop.eup %2141  ;;  %v965_v5 = vadd.f32 1.0, %v2140_v2 }
 0x536   :  { %v971_v6 = vadd.f32 1.0, %v2142_v3  ;;  %v2144_v11 = vpop.eup %2143 }
 0x537   :  { %2147 = vrcp.f32 %v965_v5  ;;  %v2146_v12 = vpop.eup %2145  ;;  %v978_v20 = vadd.f32 1.0, %v2144_v11 }
 0x538   :  { %2149 = vrcp.f32 %v971_v6 }
 0x539   :  { %2151 = vrcp.f32 %v978_v20 }
 0x541   :  { %v2148_v13 = vpop.eup %2147 }
 0x542   :  { %v2150_v16 = vpop.eup %2149  ;;  %v982_v19 = vmul.f32 %v2148_v13, %v2146_v12 }
 0x543   :  { %v981_v21 = vmul.f32 %v2150_v16, %v2570_v28  ;;  %v2152_v36 = vpop.eup %2151  ;;  %v987_v28 = vld [vmem:[#allocation4 + $0xa0] sm:$0xff] }
 0x545   :  { %v2608_v23 = vadd.f32 %v982_v19, %v981_v21 }
 0x547   :  { %2153 = vtanh.f32 %v2608_v23 }
 0x551   :  { %v2154_v38 = vpop.eup %2153 }
 0x552   :  { %v985_v43 = vmul.f32 %v2154_v38, %v2152_v36 }
 0x554   :  { %1056 = vmatmul.mubr.f32.vlgmr.msra.gmra.mrb[10].mxu0 %v985_v43  ;;  %1127 = vmatmul.mubr.f32.vlgmr.msra.gmra.mrb[10].mxu1 %v985_v43 }
 0x555   :  { %1944 = vmatpush1.bf16.msra.mxu0 %v2324_v8  ;;  %1976 = vmatpush1.bf16.msra.mxu1 %v2337_v25 }
 0x556   :  { %1946 = vmatprep.subr.bf16.mxu0 %v2326_v9  ;;  %1978 = vmatprep.subr.bf16.mxu1 %v2347_v33 }
 0x557   :  { %1230 = vmatprep.mubr.f32.mxu0 %v2279_v0  ;;  %1301 = vmatprep.mubr.f32.mxu1 %v2279_v0 }
 0x559   :  { %1948 = vmatpush1.bf16.msra.mxu0 %v2330_v14  ;;  %1980 = vmatpush1.bf16.msra.mxu1 %v2349_v37 }
 0x55a   :  { %1950 = vmatprep.subr.bf16.mxu0 %v2333_v17  ;;  %1982 = vmatprep.subr.bf16.mxu1 %v2355_v45 }
 0x55d   :  { %1952 = vmatpush1.bf16.msra.mxu0 %v2340_v26  ;;  %1984 = vmatpush1.bf16.msra.mxu1 %v2361_v48 }
 0x55e   :  { %1954 = vmatprep.subr.bf16.mxu0 %v2344_v30  ;;  %1986 = vmatprep.subr.bf16.mxu1 %v2364_v52 }
 0x561   :  { %1956 = vmatpush1.bf16.msra.mxu0 %v2353_v42  ;;  %1988 = vmatpush1.bf16.msra.mxu1 %v2373_v62 }
 0x562   :  { %1958 = vmatprep.subr.bf16.mxu0 %v2358_v46  ;;  %1990 = vmatprep.subr.bf16.mxu1 %v2376_v1 }
 0x565   :  { %1960 = vmatpush1.bf16.msra.mxu0 %v2367_v55  ;;  %1992 = vmatpush1.bf16.msra.mxu1 %v2385_v15 }
 0x566   :  { %1962 = vmatprep.subr.bf16.mxu0 %v2370_v58  ;;  %1994 = vmatprep.subr.bf16.mxu1 %v2388_v18 }
 0x569   :  { %1964 = vmatpush1.bf16.msra.mxu0 %v2379_v7  ;;  %1996 = vmatpush1.bf16.msra.mxu1 %v2397_v31 }
 0x56a   :  { %1966 = vmatprep.subr.bf16.mxu0 %v2382_v10  ;;  %1998 = vmatprep.subr.bf16.mxu1 %v2400_v32 }
 0x56d   :  { %1968 = vmatpush1.bf16.msra.mxu0 %v2391_v24  ;;  %2000 = vmatpush1.bf16.msra.mxu1 %v2407_v40 }
 0x56e   :  { %1970 = vmatprep.subr.bf16.mxu0 %v2394_v27  ;;  %2002 = vmatprep.subr.bf16.mxu1 %v2410_v41 }
 0x571   :  { %1972 = vmatpush1.bf16.msra.mxu0 %v2403_v39  ;;  %2004 = vmatpush1.bf16.msra.mxu1 %v2414_v47 }
 0x572   :  { %2006 = vmatprep.subr.bf16.mxu0 %v2322_v4  ;;  %2038 = vmatprep.subr.bf16.mxu1 %v2335_v22 }
 0x627   :  { %v1057_v34 = vpop.f32.mrb[10].mxu0  ;;  %v1128_v35 = vpop.f32.mrb[10].mxu1 }
 0x628   :  { %v1133_v44 = vadd.f32 %v1057_v34, %v987_v28  ;;  %v1059_v49 = vpop.f32.mrb[11].mxu0  ;;  %v1130_v50 = vpop.f32.mrb[11].mxu1  ;;  %v1135_v61 = vadd.f32 %v1128_v35, %v989_v59 }
 0x629   :  { %v1134_v51 = vadd.f32 %v1059_v49, %v988_v29  ;;  %v1136_v57 = vadd.f32 %v1130_v50, %v990_v56  ;;  %v1340_v50 = vld [vmem:[#allocation4 + $0xf8] sm:$0xff] }
 0x62a   :  { %v1548_v53 = vmul.f32 -1.442695, %v1133_v44 }
 0x62b   :  { %v1549_v54 = vmul.f32 -1.442695, %v1134_v51  ;;  %v1550_v60 = vmul.f32 -1.442695, %v1136_v57 }
 0x62c   :  { %2155 = vpow2.f32 %v1548_v53  ;;  %v1339_v53 = vld [vmem:[#allocation4 + $0xf0] sm:$0xff] }
 0x62d   :  { %2157 = vpow2.f32 %v1549_v54 }
 0x62e   :  { %2159 = vpow2.f32 %v1550_v60 }
 0x62f   :  { %2161 = vtanh.f32 %v1135_v61 }
 0x636   :  { %v2156_v4 = vpop.eup %2155 }
 0x637   :  { %v2158_v63 = vpop.eup %2157  ;;  %v1140_v22 = vadd.f32 1.0, %v2156_v4 }
 0x638   :  { %v1146_v2 = vadd.f32 1.0, %v2158_v63  ;;  %v2160_v3 = vpop.eup %2159 }
 0x639   :  { %2163 = vrcp.f32 %v1140_v22  ;;  %v2162_v5 = vpop.eup %2161  ;;  %v1153_v13 = vadd.f32 1.0, %v2160_v3 }
 0x63a   :  { %2165 = vrcp.f32 %v1146_v2 }
 0x63b   :  { %2167 = vrcp.f32 %v1153_v13 }
 0x643   :  { %v2164_v6 = vpop.eup %2163 }
 0x644   :  { %v2166_v11 = vpop.eup %2165  ;;  %v1157_v12 = vmul.f32 %v2164_v6, %v2162_v5 }
 0x645   :  { %v1156_v16 = vmul.f32 %v2166_v11, %v2608_v23  ;;  %v2168_v20 = vpop.eup %2167  ;;  %v1338_v23 = vld [vmem:[#allocation4 + $0xe8] sm:$0xff] }
 0x647   :  { %v2646_v19 = vadd.f32 %v1157_v12, %v1156_v16 }
 0x649   :  { %2169 = vtanh.f32 %v2646_v19 }
 0x653   :  { %v2170_v21 = vpop.eup %2169 }
 0x654   :  { %v1160_v36 = vmul.f32 %v2170_v21, %v2168_v20 }
 0x656   :  { %1231 = vmatmul.mubr.f32.vlgmr.msra.gmra.mrb[12].mxu0 %v1160_v36  ;;  %1302 = vmatmul.mubr.f32.vlgmr.msra.gmra.mrb[12].mxu1 %v1160_v36 }
 0x657   :  { %2008 = vmatpush1.bf16.msra.mxu0 %v2324_v8  ;;  %2040 = vmatpush1.bf16.msra.mxu1 %v2337_v25  ;;  %v1163_v8 = vld [vmem:[#allocation4 + $0xc8] sm:$0xff] }
 0x658   :  { %2010 = vmatprep.subr.bf16.mxu0 %v2326_v9  ;;  %2042 = vmatprep.subr.bf16.mxu1 %v2347_v33 }
 0x659   :  { %1405 = vmatprep.mubr.f32.mxu0 %v2279_v0  ;;  %1476 = vmatprep.mubr.f32.mxu1 %v2279_v0  ;;  %v1162_v0 = vld [vmem:[#allocation4 + $0xc0] sm:$0xff] }
 0x65b   :  { %2012 = vmatpush1.bf16.msra.mxu0 %v2330_v14  ;;  %2044 = vmatpush1.bf16.msra.mxu1 %v2349_v37 }
 0x65c   :  { %2014 = vmatprep.subr.bf16.mxu0 %v2333_v17  ;;  %2046 = vmatprep.subr.bf16.mxu1 %v2355_v45 }
 0x65f   :  { %2016 = vmatpush1.bf16.msra.mxu0 %v2340_v26  ;;  %2048 = vmatpush1.bf16.msra.mxu1 %v2361_v48 }
 0x660   :  { %2018 = vmatprep.subr.bf16.mxu0 %v2344_v30  ;;  %2050 = vmatprep.subr.bf16.mxu1 %v2364_v52 }
 0x663   :  { %2020 = vmatpush1.bf16.msra.mxu0 %v2353_v42  ;;  %2052 = vmatpush1.bf16.msra.mxu1 %v2373_v62  ;;  %v1165_v42 = vld [vmem:[#allocation4 + $0xd8] sm:$0xff] }
 0x664   :  { %2022 = vmatprep.subr.bf16.mxu0 %v2358_v46  ;;  %2054 = vmatprep.subr.bf16.mxu1 %v2376_v1  ;;  %v1164_v46 = vld [vmem:[#allocation4 + $0xd0] sm:$0xff] }
 0x667   :  { %2024 = vmatpush1.bf16.msra.mxu0 %v2367_v55  ;;  %2056 = vmatpush1.bf16.msra.mxu1 %v2385_v15 }
 0x668   :  { %2026 = vmatprep.subr.bf16.mxu0 %v2370_v58  ;;  %2058 = vmatprep.subr.bf16.mxu1 %v2388_v18 }
 0x66b   :  { %2028 = vmatpush1.bf16.msra.mxu0 %v2379_v7  ;;  %2060 = vmatpush1.bf16.msra.mxu1 %v2397_v31 }
 0x66c   :  { %2030 = vmatprep.subr.bf16.mxu0 %v2382_v10  ;;  %2062 = vmatprep.subr.bf16.mxu1 %v2400_v32 }
 0x66f   :  { %2032 = vmatpush1.bf16.msra.mxu0 %v2391_v24  ;;  %2064 = vmatpush1.bf16.msra.mxu1 %v2407_v40 }
 0x670   :  { %2034 = vmatprep.subr.bf16.mxu0 %v2394_v27  ;;  %2066 = vmatprep.subr.bf16.mxu1 %v2410_v41 }
 0x673   :  { %2036 = vmatpush1.bf16.msra.mxu0 %v2403_v39  ;;  %2068 = vmatpush1.bf16.msra.mxu1 %v2414_v47  ;;  %v1337_v47 = vld [vmem:[#allocation4 + $0xe0] sm:$0xff] }
 0x729   :  { %v1232_v9 = vpop.f32.mrb[12].mxu0  ;;  %v1303_v14 = vpop.f32.mrb[12].mxu1 }
 0x72a   :  { %v1308_v17 = vadd.f32 %v1232_v9, %v1162_v0  ;;  %v1234_v25 = vpop.f32.mrb[13].mxu0  ;;  %v1305_v26 = vpop.f32.mrb[13].mxu1  ;;  %v1310_v52 = vadd.f32 %v1303_v14, %v1164_v46 }
 0x72b   :  { %v1309_v30 = vadd.f32 %v1234_v25, %v1163_v8  ;;  %v1311_v45 = vadd.f32 %v1305_v26, %v1165_v42 }
 0x72c   :  { %v1551_v33 = vmul.f32 -1.442695, %v1308_v17 }
 0x72d   :  { %v1552_v37 = vmul.f32 -1.442695, %v1309_v30  ;;  %v1553_v48 = vmul.f32 -1.442695, %v1311_v45 }
 0x72e   :  { %2171 = vpow2.f32 %v1551_v33 }
 0x72f   :  { %2173 = vpow2.f32 %v1552_v37 }
 0x730   :  { %2175 = vpow2.f32 %v1553_v48 }
 0x731   :  { %2177 = vtanh.f32 %v1310_v52 }
 0x738   :  { %v2172_v55 = vpop.eup %2171 }
 0x739   :  { %v2174_v58 = vpop.eup %2173  ;;  %v1315_v62 = vadd.f32 1.0, %v2172_v55 }
 0x73a   :  { %v1321_v1 = vadd.f32 1.0, %v2174_v58  ;;  %v2176_v7 = vpop.eup %2175 }
 0x73b   :  { %2179 = vrcp.f32 %v1315_v62  ;;  %v2178_v10 = vpop.eup %2177  ;;  %v1328_v27 = vadd.f32 1.0, %v2176_v7 }
 0x73c   :  { %2181 = vrcp.f32 %v1321_v1 }
 0x73d   :  { %2183 = vrcp.f32 %v1328_v27 }
 0x745   :  { %v2180_v15 = vpop.eup %2179 }
 0x746   :  { %v2182_v18 = vpop.eup %2181  ;;  %v1332_v24 = vmul.f32 %v2180_v15, %v2178_v10 }
 0x747   :  { %v1331_v31 = vmul.f32 %v2182_v18, %v2646_v19  ;;  %v2184_v39 = vpop.eup %2183 }
 0x749   :  { %v1333_v32 = vadd.f32 %v1332_v24, %v1331_v31 }
 0x74b   :  { %2185 = vtanh.f32 %v1333_v32 }
 0x755   :  { %v2186_v40 = vpop.eup %2185 }
 0x756   :  { %v1335_v41 = vmul.f32 %v2186_v40, %v2184_v39 }
 0x758   :  { %1406 = vmatmul.mubr.f32.vlgmr.msra.gmra.mrb[14].mxu0 %v1335_v41  ;;  %1477 = vmatmul.mubr.f32.vlgmr.msra.gmra.mrb[14].mxu1 %v1335_v41 }
 0x82b   :  { %v1407_v38 = vpop.f32.mrb[14].mxu0  ;;  %v1478_v43 = vpop.f32.mrb[14].mxu1 }
 0x82c   :  { %v1483_v28 = vadd.f32 %v1407_v38, %v1337_v47  ;;  %v1409_v29 = vpop.f32.mrb[15].mxu0  ;;  %v1480_v34 = vpop.f32.mrb[15].mxu1  ;;  %v1485_v56 = vadd.f32 %v1478_v43, %v1339_v53 }
 0x82d   :  { %v1484_v35 = vadd.f32 %v1409_v29, %v1338_v23  ;;  %v1486_v51 = vadd.f32 %v1480_v34, %v1340_v50 }
 0x82e   :  { %v1554_v44 = vmul.f32 -1.442695, %v1483_v28 }
 0x82f   :  { %v1555_v49 = vmul.f32 -1.442695, %v1484_v35  ;;  %v1556_v54 = vmul.f32 -1.442695, %v1486_v51 }
 0x830   :  { %2187 = vpow2.f32 %v1554_v44 }
 0x831   :  { %2189 = vpow2.f32 %v1555_v49 }
 0x832   :  { %2191 = vpow2.f32 %v1556_v54 }
 0x833   :  { %2193 = vtanh.f32 %v1485_v56 }
 0x83a   :  { %v2188_v57 = vpop.eup %2187 }
 0x83b   :  { %v2190_v59 = vpop.eup %2189  ;;  %v1490_v60 = vadd.f32 1.0, %v2188_v57 }
 0x83c   :  { %v1496_v61 = vadd.f32 1.0, %v2190_v59  ;;  %v2192_v4 = vpop.eup %2191 }
 0x83d   :  { %2195 = vrcp.f32 %v1490_v60  ;;  %v2194_v63 = vpop.eup %2193  ;;  %v1503_v5 = vadd.f32 1.0, %v2192_v4 }
 0x83e   :  { %2197 = vrcp.f32 %v1496_v61 }
 0x83f   :  { %2199 = vrcp.f32 %v1503_v5 }
 0x847   :  { %v2196_v22 = vpop.eup %2195 }
 0x848   :  { %v2198_v2 = vpop.eup %2197  ;;  %v1507_v3 = vmul.f32 %v2196_v22, %v2194_v63 }
 0x849   :  { %v1506_v6 = vmul.f32 %v2198_v2, %v1333_v32  ;;  %v2200_v12 = vpop.eup %2199 }
 0x84b   :  { %v1508_v11 = vadd.f32 %v1507_v3, %v1506_v6 }
 0x84d   :  { %2201 = vtanh.f32 %v1508_v11 }
 0x857   :  { %v2202_v13 = vpop.eup %2201 }
 0x858   :  { %v1510_v16 = vmul.f32 %v2202_v13, %v2200_v12 }
 0x85a   :  { %1516 = vst [vmem:[#allocation9] sm:$0xff] %v1510_v16 }
 0x85b   :  { %2258 = shalt.err (!%p2255_p6)
}
 0x85c   :  { %s2259_s10 = scalar_lea.hbm %s2696_s2, 128 }
 0x85d   :  { %p2260_p7 = scmp.ne.s32.totalorder %s2696_s2, %s2259_s10  ;;  %p2263_p8 = scmp.lt.u32.totalorder %s2259_s10, %s2696_s2 }
 0x85f   :  { %p2265_p9 = pnand %p2263_p8, %p2260_p7 }
 0x861   :  { %2268 = shalt.err (!%p2265_p9)
}
 0x862   :  { %1526 = dma.vmem_to_hbm [thread:$0]  %s1524_s6, 128, %s2696_s2, [#allocation6]  }
 0x863   :  { %2273 = dma.done.wait [#allocation6], 128  }
 0x864   :  { %2274 = vsyncadd [#allocation6], 4294967168 }
 0x865   :  { %1530 = vsyncpa [#allocation5], 1 }
 0x866   :  { %1531 = vsyncpa [#allocation8], 1 }
 0x867   :  { %1532 = vsyncpa [#allocation6], 1 }

</bundles_post_ra>
